<compile_context>
chip_gen: v7x
topology: tpu7x:2x2x1
jax: 0.10.0
libtpu: 0.0.40
codegen_flags: <defaults>
</compile_context>

<pallas_src>
import jax
import jax.numpy as jnp
from jax.experimental import pallas as pl
from jax.experimental.pallas import tpu as pltpu

EPS = 1e-5


# ---------------------------------------------------------------------------
# Pass 1: transposed-conv via output-phase decomposition + per-tile BN partials
# ---------------------------------------------------------------------------
def conv_phase_kernel(xa_ref, xb_ref, w_ref, y_ref, ssum_ref, ssq_ref):
    """xa_ref : (R, W+1, Cin)   input rows i   (bottom/right zero-padded, NHWC)
       xb_ref : (R, W+1, Cin)   input rows i+1
       w_ref  : (4, Cin, 4*Cout) phase-packed weights for taps [a0, a1, b0, b1]
       y_ref  : (R, W, 4*Cout)   conv output, lanes ordered [p00 | p01 | p10 | p11]
       ssum_ref, ssq_ref : (1, 1, 4*Cout) per-tile sum / sum-of-squares (for BN)
    """
    r, w_p1, c_in = xa_ref.shape
    w = w_p1 - 1
    c4 = w_ref.shape[2]
    m = r * w

    a = xa_ref[...]
    b = xb_ref[...]
    # 2x2 dense-input neighbourhood (column shift done in-kernel, no HBM blow-up)
    a0 = a[:, 0:w, :].reshape(m, c_in)        # x[i,   j  ]
    a1 = a[:, 1:w + 1, :].reshape(m, c_in)    # x[i,   j+1]
    b0 = b[:, 0:w, :].reshape(m, c_in)        # x[i+1, j  ]
    b1 = b[:, 1:w + 1, :].reshape(m, c_in)    # x[i+1, j+1]

    # 4 MXU matmuls, each (M, Cin) x (Cin, 4*Cout), f32 accumulation: all four
    # output phases of the tile are produced in one lane-dense (M, 4*Cout) slab.
    y = jnp.dot(a0, w_ref[0], preferred_element_type=jnp.float32)
    y = y + jnp.dot(a1, w_ref[1], preferred_element_type=jnp.float32)
    y = y + jnp.dot(b0, w_ref[2], preferred_element_type=jnp.float32)
    y = y + jnp.dot(b1, w_ref[3], preferred_element_type=jnp.float32)

    y_ref[...] = y.reshape(r, w, c4).astype(y_ref.dtype)

    # Per-tile BatchNorm partials (reduced across tiles in the wrapper).
    ssum_ref[...] = jnp.sum(y, axis=0, keepdims=True)[None]
    ssq_ref[...] = jnp.sum(y * y, axis=0, keepdims=True)[None]


# ---------------------------------------------------------------------------
# Pass 2: apply BatchNorm (precomputed global scale/shift) + ReLU
# ---------------------------------------------------------------------------
def bn_relu_kernel(y_ref, scale_ref, shift_ref, o_ref):
    o_ref[...] = jnp.maximum(
        y_ref[...] * scale_ref[...] + shift_ref[...], 0.0
    ).astype(o_ref.dtype)


def _pick_row_tile(total_rows, w, c_in, c_out, itemsize=4, target_bytes=2 << 20):
    """Largest divisor of total_rows whose per-tile working set is ~<= target."""
    bytes_per_row = ((w + 1) * c_in * 2 + w * 4 * c_out) * itemsize
    r = max(1, min(total_rows, target_bytes // max(bytes_per_row, 1)))
    while total_rows % r != 0:
        r -= 1
    return r


def upblock_forward(x_nchw, w_ct, bias, gamma, beta):
    """Matches nn.ConvTranspose2d(Cin, Cout, 3, 2, 1, output_padding=1) -> BatchNorm2d -> ReLU
    (training-mode batch statistics)."""
    del bias  # cancels exactly under batch-statistic BatchNorm (see review)
    n, c_in, h, w = x_nchw.shape
    c_in_w, c_out, k, k2 = w_ct.shape
    assert (c_in_w, k, k2) == (c_in, 3, 3)
    h_out, w_out = 2 * h, 2 * w
    c4 = 4 * c_out

    # NCHW -> NHWC; one zero row/col at bottom/right covers the ih=H / iw=W taps.
    x = jnp.transpose(x_nchw, (0, 2, 3, 1)).astype(jnp.float32)
    xpad = jnp.pad(x, ((0, 0), (0, 1), (0, 1), (0, 0)))          # (N, H+1, W+1, Cin)
    xa = xpad[:, :h, :, :].reshape(n * h, w + 1, c_in)           # rows i
    xb = xpad[:, 1:, :, :].reshape(n * h, w + 1, c_in)           # rows i+1

    # Phase-packed weights.  ConvTranspose: out[2i-1+kh, 2j-1+kw] += x[i,j]*W[kh,kw]
    #   phase (0,0): a0*W[1,1]
    #   phase (0,1): a1*W[1,0] + a0*W[1,2]
    #   phase (1,0): b0*W[0,1] + a0*W[2,1]
    #   phase (1,1): b1*W[0,0] + b0*W[0,2] + a1*W[2,0] + a0*W[2,2]
    wk = w_ct.astype(jnp.float32)
    z = jnp.zeros((c_in, c_out), jnp.float32)
    tap = lambda kh, kw: wk[:, :, kh, kw]                        # (Cin, Cout)
    w4 = jnp.stack(
        [
            jnp.concatenate([tap(1, 1), tap(1, 2), tap(2, 1), tap(2, 2)], axis=1),  # a0
            jnp.concatenate([z,         tap(1, 0), z,         tap(2, 0)], axis=1),  # a1
            jnp.concatenate([z,         z,         tap(0, 1), tap(0, 2)], axis=1),  # b0
            jnp.concatenate([z,         z,         z,         tap(0, 0)], axis=1),  # b1
        ],
        axis=0,
    )                                                            # (4, Cin, 4*Cout)

    rows = n * h
    r = _pick_row_tile(rows, w, c_in, c_out)
    grid = (rows // r,)

    y1, ssum, ssq = pl.pallas_call(
        conv_phase_kernel,
        out_shape=(
            jax.ShapeDtypeStruct((rows, w, c4), jnp.float32),
            jax.ShapeDtypeStruct((grid[0], 1, c4), jnp.float32),
            jax.ShapeDtypeStruct((grid[0], 1, c4), jnp.float32),
        ),
        grid=grid,
        in_specs=[
            pl.BlockSpec((r, w + 1, c_in), lambda i: (i, 0, 0)),
            pl.BlockSpec((r, w + 1, c_in), lambda i: (i, 0, 0)),
            pl.BlockSpec((4, c_in, c4), lambda i: (0, 0, 0)),
        ],
        out_specs=(
            pl.BlockSpec((r, w, c4), lambda i: (i, 0, 0)),
            pl.BlockSpec((1, 1, c4), lambda i: (i, 0, 0)),
            pl.BlockSpec((1, 1, c4), lambda i: (i, 0, 0)),
        ),
        compiler_params=pltpu.CompilerParams(dimension_semantics=("parallel",)),
    )(xa, xb, w4)

    # Global BatchNorm statistics (training-mode batch stats, biased variance).
    cnt = jnp.float32(n * h_out * w_out)
    s1 = jnp.sum(ssum, axis=0).reshape(4, c_out).sum(axis=0)
    s2 = jnp.sum(ssq, axis=0).reshape(4, c_out).sum(axis=0)
    mean = s1 / cnt
    var = jnp.maximum(s2 / cnt - mean * mean, 0.0)
    inv = jax.lax.rsqrt(var + jnp.float32(EPS))
    scale = gamma.astype(jnp.float32) * inv
    shift = beta.astype(jnp.float32) - mean * scale
    scale4 = jnp.tile(scale, 4).reshape(1, 1, c4)   # phase-major lane order
    shift4 = jnp.tile(shift, 4).reshape(1, 1, c4)

    out_phase = pl.pallas_call(
        bn_relu_kernel,
        out_shape=jax.ShapeDtypeStruct((rows, w, c4), x_nchw.dtype),
        grid=grid,
        in_specs=[
            pl.BlockSpec((r, w, c4), lambda i: (i, 0, 0)),
            pl.BlockSpec((1, 1, c4), lambda i: (0, 0, 0)),
            pl.BlockSpec((1, 1, c4), lambda i: (0, 0, 0)),
        ],
        out_specs=pl.BlockSpec((r, w, c4), lambda i: (i, 0, 0)),
        compiler_params=pltpu.CompilerParams(dimension_semantics=("parallel",)),
    )(y1, scale4, shift4)

    # Phase-major (N*H, W, [ph, pw, Cout]) -> NCHW (N, Cout, 2H, 2W); this single
    # wrapper transpose does both the phase un-interleave and NHWC->NCHW.
    z6 = out_phase.reshape(n, h, w, 2, 2, c_out)
    return jnp.transpose(z6, (0, 5, 1, 3, 2, 4)).reshape(n, c_out, h_out, w_out)


def upblock_reference(x_nchw, w_ct, bias, gamma, beta, *, stride=2, padding=1, output_padding=1):
    """Pure-JAX reference (XLA conv) for a sanity check."""
    k = w_ct.shape[2]
    lo = k - 1 - padding
    hi = k - 1 - padding + output_padding
    w_conv = jnp.transpose(w_ct[:, :, ::-1, ::-1], (1, 0, 2, 3))  # (Cout, Cin, K, K)
    y = jax.lax.conv_general_dilated(
        x_nchw, w_conv, window_strides=(1, 1),
        padding=((lo, hi), (lo, hi)), lhs_dilation=(stride, stride),
        dimension_numbers=("NCHW", "OIHW", "NCHW"),
    )
    y = y + bias[None, :, None, None]
    mean = y.mean(axis=(0, 2, 3), keepdims=True)
    var = y.var(axis=(0, 2, 3), keepdims=True)  # biased, like BN training stats
    y = (y - mean) / jnp.sqrt(var + EPS) * gamma[None, :, None, None] + beta[None, :, None, None]
    return jnp.maximum(y, 0.0)


if __name__ == "__main__":
    key = jax.random.PRNGKey(0)
    n, c_in, c_out, h, w = 2, 4, 8, 16, 16

    k_x, k_w, k_b = jax.random.split(key, 3)
    x = jax.random.normal(k_x, (n, c_in, h, w), jnp.float32)
    # ConvTranspose2d weight shape: (Cin, Cout, kH, kW)
    w_ct = jax.random.normal(k_w, (c_in, c_out, 3, 3), jnp.float32) * 0.1
    bias = jax.random.normal(k_b, (c_out,), jnp.float32) * 0.1
    gamma = jnp.ones((c_out,), jnp.float32)   # BatchNorm2d default weight
    beta = jnp.zeros((c_out,), jnp.float32)   # BatchNorm2d default bias

    y = upblock_forward(x, w_ct, bias, gamma, beta)
    jax.block_until_ready(y)

    assert y.shape == (n, c_out, 2 * h, 2 * w), y.shape
    y_ref = upblock_reference(x, w_ct, bias, gamma, beta)
    assert jnp.allclose(y, y_ref, atol=1e-4, rtol=1e-4), float(jnp.max(jnp.abs(y - y_ref)))

    # TODO(synk): BatchNorm running_mean/running_var buffer updates (training
    # side effect) are not modeled; only the forward output tensor is produced.
    print("KERNEL_OK")
</pallas_src>

<mosaic_0001>
module attributes {stable_mosaic.version = 11 : i64} {
  func.func @conv_phase_kernel(%arg0: i32, %arg1: memref<32x17x4xf32, #tpu.memory_space<vmem>>, %arg2: memref<32x17x4xf32, #tpu.memory_space<vmem>>, %arg3: memref<4x4x32xf32, #tpu.memory_space<vmem>>, %arg4: memref<32x16x32xf32, #tpu.memory_space<vmem>>, %arg5: memref<1x1x32xf32, #tpu.memory_space<vmem>>, %arg6: memref<1x1x32xf32, #tpu.memory_space<vmem>>) attributes {dimension_semantics = [#tpu.dimension_semantics<parallel>], iteration_bounds = array<i64: 1>, scalar_prefetch = 0 : i64, scratch_operands = 0 : i64, tpu.core_type = #tpu.core_type<tc>, window_params = [{transform_indices = @transform_0, window_bounds = array<i64: 32, 17, 4>}, {transform_indices = @transform_1, window_bounds = array<i64: 32, 17, 4>}, {pipeline_mode = #tpu.pipeline_mode<synchronous>, transform_indices = @transform_2, window_bounds = array<i64: 4, 4, 32>}, {transform_indices = @transform_3, window_bounds = array<i64: 32, 16, 32>}, {transform_indices = @transform_4, window_bounds = array<i64: 1, 1, 32>}, {transform_indices = @transform_5, window_bounds = array<i64: 1, 1, 32>}]} {
    %c0 = arith.constant 0 : index
    %c0_0 = arith.constant 0 : index
    %c0_1 = arith.constant 0 : index
    %0 = vector.load %arg1[%c0, %c0_0, %c0_1] : memref<32x17x4xf32, #tpu.memory_space<vmem>>, vector<32x17x4xf32>
    %c0_2 = arith.constant 0 : index
    %c0_3 = arith.constant 0 : index
    %c0_4 = arith.constant 0 : index
    %1 = vector.load %arg2[%c0_2, %c0_3, %c0_4] : memref<32x17x4xf32, #tpu.memory_space<vmem>>, vector<32x17x4xf32>
    %2 = vector.extract_strided_slice %0 {offsets = [0, 0, 0], sizes = [32, 16, 4], strides = [1, 1, 1]} : vector<32x17x4xf32> to vector<32x16x4xf32>
    %3 = vector.shape_cast %2 : vector<32x16x4xf32> to vector<512x4xf32>
    %4 = vector.extract_strided_slice %0 {offsets = [0, 1, 0], sizes = [32, 16, 4], strides = [1, 1, 1]} : vector<32x17x4xf32> to vector<32x16x4xf32>
    %5 = vector.shape_cast %4 : vector<32x16x4xf32> to vector<512x4xf32>
    %6 = vector.extract_strided_slice %1 {offsets = [0, 0, 0], sizes = [32, 16, 4], strides = [1, 1, 1]} : vector<32x17x4xf32> to vector<32x16x4xf32>
    %7 = vector.shape_cast %6 : vector<32x16x4xf32> to vector<512x4xf32>
    %8 = vector.extract_strided_slice %1 {offsets = [0, 1, 0], sizes = [32, 16, 4], strides = [1, 1, 1]} : vector<32x17x4xf32> to vector<32x16x4xf32>
    %9 = vector.shape_cast %8 : vector<32x16x4xf32> to vector<512x4xf32>
    %c0_5 = arith.constant 0 : index
    %c0_6 = arith.constant 0 : index
    %c0_7 = arith.constant 0 : index
    %10 = vector.load %arg3[%c0_5, %c0_6, %c0_7] : memref<4x4x32xf32, #tpu.memory_space<vmem>>, vector<1x4x32xf32>
    %11 = vector.shape_cast %10 : vector<1x4x32xf32> to vector<4x32xf32>
    %cst = arith.constant dense<0.000000e+00> : vector<512x32xf32>
    %12 = tpu.matmul %3, %11, %cst {dimension_numbers = #tpu.dot_dimension_numbers<[1], [0], [0], [1], [0, 0, 1, 1], [], []>} : vector<512x4xf32>, vector<4x32xf32>, vector<512x32xf32> -> vector<512x32xf32>
    %c1 = arith.constant 1 : index
    %c0_8 = arith.constant 0 : index
    %c0_9 = arith.constant 0 : index
    %13 = vector.load %arg3[%c1, %c0_8, %c0_9] : memref<4x4x32xf32, #tpu.memory_space<vmem>>, vector<1x4x32xf32>
    %14 = vector.shape_cast %13 : vector<1x4x32xf32> to vector<4x32xf32>
    %cst_10 = arith.constant dense<0.000000e+00> : vector<512x32xf32>
    %15 = tpu.matmul %5, %14, %cst_10 {dimension_numbers = #tpu.dot_dimension_numbers<[1], [0], [0], [1], [0, 0, 1, 1], [], []>} : vector<512x4xf32>, vector<4x32xf32>, vector<512x32xf32> -> vector<512x32xf32>
    %16 = arith.addf %12, %15 : vector<512x32xf32>
    %c2 = arith.constant 2 : index
    %c0_11 = arith.constant 0 : index
    %c0_12 = arith.constant 0 : index
    %17 = vector.load %arg3[%c2, %c0_11, %c0_12] : memref<4x4x32xf32, #tpu.memory_space<vmem>>, vector<1x4x32xf32>
    %18 = vector.shape_cast %17 : vector<1x4x32xf32> to vector<4x32xf32>
    %cst_13 = arith.constant dense<0.000000e+00> : vector<512x32xf32>
    %19 = tpu.matmul %7, %18, %cst_13 {dimension_numbers = #tpu.dot_dimension_numbers<[1], [0], [0], [1], [0, 0, 1, 1], [], []>} : vector<512x4xf32>, vector<4x32xf32>, vector<512x32xf32> -> vector<512x32xf32>
    %20 = arith.addf %16, %19 : vector<512x32xf32>
    %c3 = arith.constant 3 : index
    %c0_14 = arith.constant 0 : index
    %c0_15 = arith.constant 0 : index
    %21 = vector.load %arg3[%c3, %c0_14, %c0_15] : memref<4x4x32xf32, #tpu.memory_space<vmem>>, vector<1x4x32xf32>
    %22 = vector.shape_cast %21 : vector<1x4x32xf32> to vector<4x32xf32>
    %cst_16 = arith.constant dense<0.000000e+00> : vector<512x32xf32>
    %23 = tpu.matmul %9, %22, %cst_16 {dimension_numbers = #tpu.dot_dimension_numbers<[1], [0], [0], [1], [0, 0, 1, 1], [], []>} : vector<512x4xf32>, vector<4x32xf32>, vector<512x32xf32> -> vector<512x32xf32>
    %24 = arith.addf %20, %23 : vector<512x32xf32>
    %25 = vector.shape_cast %24 : vector<512x32xf32> to vector<32x16x32xf32>
    %c0_17 = arith.constant 0 : index
    %c0_18 = arith.constant 0 : index
    %c0_19 = arith.constant 0 : index
    %26 = vector.load %arg4[%c0_17, %c0_18, %c0_19] : memref<32x16x32xf32, #tpu.memory_space<vmem>>, vector<32x16x32xf32>
    tpu.vector_store %arg4[%c0_17, %c0_18, %c0_19], %25 {strides = array<i32>} : memref<32x16x32xf32, #tpu.memory_space<vmem>>, vector<32x16x32xf32>,
    %cst_20 = arith.constant dense<0.000000e+00> : vector<32xf32>
    %27 = vector.multi_reduction <add>, %24, %cst_20 [0] : vector<512x32xf32> to vector<32xf32>
    %28 = vector.shape_cast %27 : vector<32xf32> to vector<1x32xf32>
    %29 = vector.shape_cast %28 : vector<1x32xf32> to vector<1x1x32xf32>
    %c0_21 = arith.constant 0 : index
    %c0_22 = arith.constant 0 : index
    %c0_23 = arith.constant 0 : index
    %30 = vector.load %arg5[%c0_21, %c0_22, %c0_23] : memref<1x1x32xf32, #tpu.memory_space<vmem>>, vector<1x1x32xf32>
    tpu.vector_store %arg5[%c0_21, %c0_22, %c0_23], %29 {strides = array<i32>} : memref<1x1x32xf32, #tpu.memory_space<vmem>>, vector<1x1x32xf32>,
    %31 = arith.mulf %24, %24 : vector<512x32xf32>
    %cst_24 = arith.constant dense<0.000000e+00> : vector<32xf32>
    %32 = vector.multi_reduction <add>, %31, %cst_24 [0] : vector<512x32xf32> to vector<32xf32>
    %33 = vector.shape_cast %32 : vector<32xf32> to vector<1x32xf32>
    %34 = vector.shape_cast %33 : vector<1x32xf32> to vector<1x1x32xf32>
    %c0_25 = arith.constant 0 : index
    %c0_26 = arith.constant 0 : index
    %c0_27 = arith.constant 0 : index
    %35 = vector.load %arg6[%c0_25, %c0_26, %c0_27] : memref<1x1x32xf32, #tpu.memory_space<vmem>>, vector<1x1x32xf32>
    tpu.vector_store %arg6[%c0_25, %c0_26, %c0_27], %34 {strides = array<i32>} : memref<1x1x32xf32, #tpu.memory_space<vmem>>, vector<1x1x32xf32>,
    return
  }
  func.func @transform_0(%arg0: i32) -> (i32, i32, i32) {
    %c0_i32 = arith.constant 0 : i32
    %c0_i32_0 = arith.constant 0 : i32
    %c0_i32_1 = arith.constant 0 : i32
    return %arg0, %c0_i32, %c0_i32_0 : i32, i32, i32
  }
  func.func @transform_1(%arg0: i32) -> (i32, i32, i32) {
    %c0_i32 = arith.constant 0 : i32
    %c0_i32_0 = arith.constant 0 : i32
    %c0_i32_1 = arith.constant 0 : i32
    return %arg0, %c0_i32, %c0_i32_0 : i32, i32, i32
  }
  func.func @transform_2(%arg0: i32) -> (i32, i32, i32) {
    %c0_i32 = arith.constant 0 : i32
    %c0_i32_0 = arith.constant 0 : i32
    %c0_i32_1 = arith.constant 0 : i32
    %c0_i32_2 = arith.constant 0 : i32
    return %c0_i32, %c0_i32_0, %c0_i32_1 : i32, i32, i32
  }
  func.func @transform_3(%arg0: i32) -> (i32, i32, i32) {
    %c0_i32 = arith.constant 0 : i32
    %c0_i32_0 = arith.constant 0 : i32
    %c0_i32_1 = arith.constant 0 : i32
    return %arg0, %c0_i32, %c0_i32_0 : i32, i32, i32
  }
  func.func @transform_4(%arg0: i32) -> (i32, i32, i32) {
    %c0_i32 = arith.constant 0 : i32
    %c0_i32_0 = arith.constant 0 : i32
    %c0_i32_1 = arith.constant 0 : i32
    return %arg0, %c0_i32, %c0_i32_0 : i32, i32, i32
  }
  func.func @transform_5(%arg0: i32) -> (i32, i32, i32) {
    %c0_i32 = arith.constant 0 : i32
    %c0_i32_0 = arith.constant 0 : i32
    %c0_i32_1 = arith.constant 0 : i32
    return %arg0, %c0_i32, %c0_i32_0 : i32, i32, i32
  }
}

</mosaic_0001>

<bundles_post_ra>
// kernel: tpu_custom_call.1
= control target key start
LH: loop header
LB: loop body
LE: loop exit
PB: predicated region body
PF: predicated region fallthrough
CT: control target
= control target key end

     0   :  { %11 = vsyncpa [#allocation3], 0  ;;  %vm856_vm0 = vcmask 1043456   ;;  %vm727_vm1 = vcmask 31744   ;;  %vm307_vm2 = vcmask 1046528   ;;  %s6416_s0 = inlined_call_operand.vmem [shape: f32[32,17,4], index: 0, kind: input, shape index: {}]   ;;  %s6417_s1 = inlined_call_operand.vmem [shape: f32[32,17,4], index: 1, kind: input, shape index: {}]   ;;  %s6418_s2 = inlined_call_operand.vmem [shape: f32[4,4,32], index: 2, kind: input, shape index: {}]   ;;  %s6419_s3 = inlined_call_operand.hbm [shape: f32[32,16,32], index: 3, kind: output, shape index: {0}]   ;;  %s6420_s4 = inlined_call_operand.hbm [shape: f32[1,1,32], index: 4, kind: output, shape index: {1}]   ;;  %s6421_s5 = inlined_call_operand.hbm [shape: f32[1,1,32], index: 5, kind: output, shape index: {2}]  }
   0x1   :  { %v3497_v0 = vld [vmem:[%s6418_s2 + $0x8] sm:$0xf]  ;;  %v3366_v1 = vld [vmem:[%s6418_s2 + $0x4] sm:$0xf]  ;;  %v724_v10 = vld [vmem:[%s6418_s2] sm:$0xf] }
   0x2   :  { %v115_v2 = vld [vmem:[%s6417_s1] sm:$0xff]  ;;  %4085 = vmatprep.subr.msk.mxu0 %vm856_vm0, %v3497_v0  ;;  %3889 = vmatprep.subr.msk.mxu1 %vm856_vm0, %v3366_v1  ;;  %v4610_v4 = vld [vmem:[%s6417_s1 + $0x8] sm:$0xff]  ;;  %v118_v11 = vld [vmem:[%s6417_s1 + $0x18] sm:$0xff] }
   0x3   :  { %v564_v3 = vrot.slane %v115_v2, 1  ;;  %v19_v5 = vld [vmem:[%s6416_s0] sm:$0xff]  ;;  %v20_v6 = vld [vmem:[%s6416_s0 + $0x8] sm:$0xff]  ;;  %4086 = vmatpush3.msk.msra.mxu0 %vm856_vm0, %v3497_v0  ;;  %4087 = vmatprep.mubr.msk.f32.mxu0 %vm727_vm1, %v115_v2  ;;  %v6435_v7 = vrot.slane %v4610_v4, 1  ;;  %v21_v13 = vld [vmem:[%s6416_s0 + $0x10] sm:$0x1] }
   0x4   :  { %v308_v8 = vrot.slane %v19_v5, 1  ;;  %v309_v9 = vrot.slane %v20_v6, 1  ;;  %3890 = vmatpush3.msk.msra.mxu1 %vm856_vm0, %v3366_v1  ;;  %4088 = vmatmul.mubr.msk.f32.vlgmr.msra.gmra.mrb[0].mxu0 %vm727_vm1, %v4610_v4  ;;  %v3563_v12 = vld [vmem:[%s6418_s2 + $0xc] sm:$0xf]  ;;  %v569_v14 = vrot.slane %v118_v11, 1  ;;  %v4639_v15 = vld [vmem:[%s6417_s1 + $0x20] sm:$0xff] }
   0x5   :  { %3987 = vmatprep.subr.msk.mxu1 %vm856_vm0, %v724_v10  ;;  %4183 = vmatprep.subr.msk.mxu0 %vm856_vm0, %v3563_v12  ;;  %v311_v17 = vrot.slane %v21_v13, 1  ;;  %v6433_v18 = vrot.slane %v4639_v15, 1  ;;  %v22_v19 = vld [vmem:[%s6416_s0 + $0x18] sm:$0xff]  ;;  %v23_v20 = vld [vmem:[%s6416_s0 + $0x20] sm:$0xff]  ;;  %v24_v21 = vld [vmem:[%s6416_s0 + $0x28] sm:$0x1]  ;;  %v4657_v22 = vsel %vm307_vm2, %v564_v3, %v6435_v7 }
   0x6   :  { %v310_v16 = vsel %vm307_vm2, %v308_v8, %v309_v9  ;;  %4184 = vmatpush3.msk.msra.mxu0 %vm856_vm0, %v3563_v12  ;;  %v313_v23 = vrot.slane %v22_v19, 1  ;;  %v314_v24 = vrot.slane %v23_v20, 1  ;;  %v316_v25 = vrot.slane %v24_v21, 1  ;;  %v25_v26 = vld [vmem:[%s6416_s0 + $0x30] sm:$0xff]  ;;  %4090 = vmatprep.mubr.msk.f32.mxu0 %vm727_vm1, %v118_v11  ;;  %v26_v29 = vld [vmem:[%s6416_s0 + $0x38] sm:$0xff]  ;;  %v28_v36 = vld [vmem:[%s6416_s0 + $0x48] sm:$0xff] }
   0x7   :  { %3891 = vmatprep.mubr.msk.f32.mxu1 %vm727_vm1, %v310_v16  ;;  %v312_v27 = vsel %vm307_vm2, %v309_v9, %v311_v17  ;;  %v121_v28 = vld [vmem:[%s6417_s1 + $0x30] sm:$0xff]  ;;  %v318_v30 = vrot.slane %v25_v26, 1  ;;  %v27_v31 = vld [vmem:[%s6416_s0 + $0x40] sm:$0x1]  ;;  %v4682_v34 = vld [vmem:[%s6417_s1 + $0x38] sm:$0xff]  ;;  %v319_v35 = vrot.slane %v26_v29, 1  ;;  %v4697_v41 = vsel %vm307_vm2, %v569_v14, %v6433_v18 }
   0x8   :  { %3892 = vmatmul.mubr.msk.f32.vlgmr.msra.gmra.mrb[0].mxu1 %vm727_vm1, %v312_v27  ;;  %4091 = vmatmul.mubr.msk.f32.gmra.mrb[2].mxu0 %vm727_vm1, %v4639_v15  ;;  %v315_v32 = vsel %vm307_vm2, %v313_v23, %v314_v24  ;;  %v574_v33 = vrot.slane %v121_v28, 1  ;;  %v317_v37 = vsel %vm307_vm2, %v314_v24, %v316_v25  ;;  %v6432_v38 = vrot.slane %v4682_v34, 1  ;;  %v29_v40 = vld [vmem:[%s6416_s0 + $0x50] sm:$0xff]  ;;  %v124_v43 = vld [vmem:[%s6417_s1 + $0x48] sm:$0xff]  ;;  %v30_v46 = vld [vmem:[%s6416_s0 + $0x58] sm:$0x1] }
   0x9   :  { %3988 = vmatpush3.msk.msra.mxu1 %vm856_vm0, %v724_v10  ;;  %3894 = vmatprep.mubr.msk.f32.mxu1 %vm727_vm1, %v315_v32  ;;  %v321_v39 = vrot.slane %v27_v31, 1  ;;  %v320_v42 = vsel %vm307_vm2, %v318_v30, %v319_v35  ;;  %v323_v44 = vrot.slane %v28_v36, 1  ;;  %v324_v45 = vrot.slane %v29_v40, 1  ;;  %v31_v47 = vld [vmem:[%s6416_s0 + $0x60] sm:$0xff]  ;;  %v32_v48 = vld [vmem:[%s6416_s0 + $0x68] sm:$0xff]  ;;  %v4719_v50 = vld [vmem:[%s6417_s1 + $0x50] sm:$0xff] }
   0xa   :  { %4093 = vmatprep.mubr.msk.f32.mxu0 %vm727_vm1, %v121_v28  ;;  %v579_v49 = vrot.slane %v124_v43, 1  ;;  %v6431_v52 = vrot.slane %v4719_v50, 1  ;;  %v326_v53 = vrot.slane %v30_v46, 1  ;;  %v4728_v54 = vsel %vm307_vm2, %v574_v33, %v6432_v38  ;;  %v127_v56 = vld [vmem:[%s6417_s1 + $0x60] sm:$0xff]  ;;  %v33_v59 = vld [vmem:[%s6416_s0 + $0x70] sm:$0x1] }
   0xb   :  { %v322_v51 = vsel %vm307_vm2, %v319_v35, %v321_v39  ;;  %v325_v55 = vsel %vm307_vm2, %v323_v44, %v324_v45  ;;  %v328_v57 = vrot.slane %v31_v47, 1  ;;  %v329_v58 = vrot.slane %v32_v48, 1  ;;  %v34_v60 = vld [vmem:[%s6416_s0 + $0x78] sm:$0xff]  ;;  %v35_v61 = vld [vmem:[%s6416_s0 + $0x80] sm:$0xff]  ;;  %v4749_v63 = vld [vmem:[%s6417_s1 + $0x68] sm:$0xff] }
   0xc   :  { %3895 = vmatmul.mubr.msk.f32.gmra.mrb[2].mxu1 %vm727_vm1, %v317_v37  ;;  %4094 = vmatmul.mubr.msk.f32.gmra.mrb[4].mxu0 %vm727_vm1, %v4682_v34  ;;  %v584_v62 = vrot.slane %v127_v56, 1  ;;  %v327_v0 = vsel %vm307_vm2, %v324_v45, %v326_v53  ;;  %v6430_v1 = vrot.slane %v4749_v63, 1  ;;  %v331_v2 = vrot.slane %v33_v59, 1  ;;  %v130_v6 = vld [vmem:[%s6417_s1 + $0x78] sm:$0xff]  ;;  %v36_v10 = vld [vmem:[%s6416_s0 + $0x88] sm:$0x1] }
   0xd   :  { %3897 = vmatprep.mubr.msk.f32.mxu1 %vm727_vm1, %v320_v42  ;;  %4096 = vmatprep.mubr.msk.f32.mxu0 %vm727_vm1, %v124_v43  ;;  %v4758_v3 = vsel %vm307_vm2, %v579_v49, %v6431_v52  ;;  %v330_v5 = vsel %vm307_vm2, %v328_v57, %v329_v58  ;;  %v333_v8 = vrot.slane %v34_v60, 1  ;;  %v334_v9 = vrot.slane %v35_v61, 1  ;;  %v4770_v11 = vld [vmem:[%s6416_s0 + $0x90] sm:$0xff]  ;;  %v38_v12 = vld [vmem:[%s6416_s0 + $0x98] sm:$0xff]  ;;  %v4781_v14 = vld [vmem:[%s6417_s1 + $0x80] sm:$0xff] }
   0xe   :  { %v589_v13 = vrot.slane %v130_v6, 1  ;;  %v332_v16 = vsel %vm307_vm2, %v329_v58, %v331_v2  ;;  %v6428_v17 = vrot.slane %v4781_v14, 1  ;;  %v336_v19 = vrot.slane %v36_v10, 1  ;;  %v133_v23 = vld [vmem:[%s6417_s1 + $0x90] sm:$0xff]  ;;  %v39_v26 = vld [vmem:[%s6416_s0 + $0xa0] sm:$0x1] }
   0xf   :  { %v4790_v20 = vsel %vm307_vm2, %v584_v62, %v6430_v1  ;;  %v335_v21 = vsel %vm307_vm2, %v333_v8, %v334_v9  ;;  %v338_v24 = vrot.slane %v4770_v11, 1  ;;  %v339_v25 = vrot.slane %v38_v12, 1  ;;  %v4803_v27 = vld [vmem:[%s6416_s0 + $0xa8] sm:$0xff]  ;;  %v4808_v28 = vld [vmem:[%s6416_s0 + $0xb0] sm:$0xff]  ;;  %v4816_v30 = vld [vmem:[%s6417_s1 + $0x98] sm:$0xff] }
  0x10   :  { %3898 = vmatmul.mubr.msk.f32.gmra.mrb[4].mxu1 %vm727_vm1, %v322_v51  ;;  %4097 = vmatmul.mubr.msk.f32.gmra.mrb[6].mxu0 %vm727_vm1, %v4719_v50  ;;  %v594_v29 = vrot.slane %v133_v23, 1  ;;  %v337_v31 = vsel %vm307_vm2, %v334_v9, %v336_v19  ;;  %v6427_v32 = vrot.slane %v4816_v30, 1  ;;  %v341_v33 = vrot.slane %v39_v26, 1  ;;  %v136_v37 = vld [vmem:[%s6417_s1 + $0xa8] sm:$0xff]  ;;  %v42_v42 = vld [vmem:[%s6416_s0 + $0xb8] sm:$0x1] }
  0x11   :  { %3900 = vmatprep.mubr.msk.f32.mxu1 %vm727_vm1, %v325_v55  ;;  %4099 = vmatprep.mubr.msk.f32.mxu0 %vm727_vm1, %v127_v56  ;;  %v4825_v35 = vsel %vm307_vm2, %v589_v13, %v6428_v17  ;;  %v340_v36 = vsel %vm307_vm2, %v338_v24, %v339_v25  ;;  %v343_v39 = vrot.slane %v4803_v27, 1  ;;  %v344_v40 = vrot.slane %v4808_v28, 1  ;;  %v4839_v43 = vld [vmem:[%s6416_s0 + $0xc0] sm:$0xff]  ;;  %v4844_v44 = vld [vmem:[%s6416_s0 + $0xc8] sm:$0xff]  ;;  %v4852_v46 = vld [vmem:[%s6417_s1 + $0xb0] sm:$0xff] }
  0x12   :  { %v599_v45 = vrot.slane %v136_v37, 1  ;;  %v342_v47 = vsel %vm307_vm2, %v339_v25, %v341_v33  ;;  %v6426_v48 = vrot.slane %v4852_v46, 1  ;;  %v346_v49 = vrot.slane %v42_v42, 1  ;;  %v139_v55 = vld [vmem:[%s6417_s1 + $0xc0] sm:$0xff]  ;;  %v45_v58 = vld [vmem:[%s6416_s0 + $0xd0] sm:$0x1] }
  0x13   :  { %v4861_v51 = vsel %vm307_vm2, %v594_v29, %v6427_v32  ;;  %v345_v53 = vsel %vm307_vm2, %v343_v39, %v344_v40  ;;  %v348_v56 = vrot.slane %v4839_v43, 1  ;;  %v349_v57 = vrot.slane %v4844_v44, 1  ;;  %v4875_v59 = vld [vmem:[%s6416_s0 + $0xd8] sm:$0xff]  ;;  %v4880_v60 = vld [vmem:[%s6416_s0 + $0xe0] sm:$0xff]  ;;  %v4888_v62 = vld [vmem:[%s6417_s1 + $0xc8] sm:$0xff] }
  0x14   :  { %3901 = vmatmul.mubr.msk.f32.gmra.mrb[6].mxu1 %vm727_vm1, %v327_v0  ;;  %4100 = vmatmul.mubr.msk.f32.gmra.mrb[8].mxu0 %vm727_vm1, %v4749_v63  ;;  %v604_v61 = vrot.slane %v139_v55, 1  ;;  %v347_v0 = vsel %vm307_vm2, %v344_v40, %v346_v49  ;;  %v6425_v2 = vrot.slane %v4888_v62, 1  ;;  %v142_v9 = vld [vmem:[%s6417_s1 + $0xd8] sm:$0xff]  ;;  %v353_v10 = vrot.slane %v4875_v59, 1  ;;  %v48_v13 = vld [vmem:[%s6416_s0 + $0xe8] sm:$0x1] }
  0x15   :  { %3903 = vmatprep.mubr.msk.f32.mxu1 %vm727_vm1, %v330_v5  ;;  %4102 = vmatprep.mubr.msk.f32.mxu0 %vm727_vm1, %v130_v6  ;;  %v351_v5 = vrot.slane %v45_v58, 1  ;;  %v4897_v6 = vsel %vm307_vm2, %v599_v45, %v6426_v48  ;;  %v350_v8 = vsel %vm307_vm2, %v348_v56, %v349_v57  ;;  %v354_v12 = vrot.slane %v4880_v60, 1  ;;  %v4916_v19 = vld [vmem:[%s6416_s0 + $0xf8] sm:$0xff]  ;;  %v145_v33 = vld [vmem:[%s6417_s1 + $0xf0] sm:$0xff]  ;;  %v51_v39 = vld [vmem:[%s6416_s0 + $0x100] sm:$0x1] }
  0x16   :  { %v356_v26 = vrot.slane %v48_v13, 1  ;;  %v4933_v29 = vsel %vm307_vm2, %v604_v61, %v6425_v2  ;;  %v4947_v40 = vld [vmem:[%s6416_s0 + $0x108] sm:$0xff]  ;;  %v4952_v42 = vld [vmem:[%s6416_s0 + $0x110] sm:$0xff]  ;;  %v614_v45 = vrot.slane %v145_v33, 1 }
  0x17   :  { %v352_v24 = vsel %vm307_vm2, %v349_v57, %v351_v5  ;;  %v148_v58 = vld [vmem:[%s6417_s1 + $0x108] sm:$0xff]  ;;  %v363_v61 = vrot.slane %v4947_v40, 1  ;;  %v54_v5 = vld [vmem:[%s6416_s0 + $0x118] sm:$0x1]  ;;  %v157_v17 = vld [vmem:[%s6417_s1 + $0x150] sm:$0xff] }
  0x18   :  { %3904 = vmatmul.mubr.msk.f32.gmra.mrb[8].mxu1 %vm727_vm1, %v332_v16  ;;  %4103 = vmatmul.mubr.msk.f32.gmra.mrb[10].mxu0 %vm727_vm1, %v4781_v14  ;;  %v4911_v16 = vld [vmem:[%s6416_s0 + $0xf0] sm:$0xff]  ;;  %v357_v49 = vsel %vm307_vm2, %v354_v12, %v356_v26  ;;  %v160_v18 = vld [vmem:[%s6417_s1 + $0x168] sm:$0xff] }
  0x19   :  { %3906 = vmatprep.mubr.msk.f32.mxu1 %vm727_vm1, %v335_v21  ;;  %4105 = vmatprep.mubr.msk.f32.mxu0 %vm727_vm1, %v133_v23  ;;  %v609_v21 = vrot.slane %v142_v9, 1  ;;  %v4924_v23 = vld [vmem:[%s6417_s1 + $0xe0] sm:$0xff] }
  0x1a   :  { %v6423_v25 = vrot.slane %v4924_v23, 1 }
  0x1c   :  { %3907 = vmatmul.mubr.msk.f32.gmra.mrb[10].mxu1 %vm727_vm1, %v337_v31  ;;  %4106 = vmatmul.mubr.msk.f32.gmra.mrb[12].mxu0 %vm727_vm1, %v4816_v30  ;;  %v355_v31 = vsel %vm307_vm2, %v353_v10, %v354_v12  ;;  %v4969_v56 = vsel %vm307_vm2, %v609_v21, %v6423_v25  ;;  %v619_v10 = vrot.slane %v148_v58, 1  ;;  %v4996_v12 = vld [vmem:[%s6417_s1 + $0x110] sm:$0xff]  ;;  %v154_v25 = vld [vmem:[%s6417_s1 + $0x138] sm:$0xff] }
  0x1d   :  { %3909 = vmatprep.mubr.msk.f32.mxu1 %vm727_vm1, %v340_v36  ;;  %4108 = vmatprep.mubr.msk.f32.mxu0 %vm727_vm1, %v136_v37  ;;  %v358_v36 = vrot.slane %v4911_v16, 1  ;;  %v359_v37 = vrot.slane %v4916_v19, 1  ;;  %v6424_v21 = vrot.slane %v4996_v12, 1 }
  0x1f   :  { %v360_v57 = vsel %vm307_vm2, %v358_v36, %v359_v37 }
  0x20   :  { %3910 = vmatmul.mubr.msk.f32.gmra.mrb[12].mxu1 %vm727_vm1, %v342_v47  ;;  %4109 = vmatmul.mubr.msk.f32.gmra.mrb[14].mxu0 %vm727_vm1, %v4852_v46  ;;  %v4960_v47 = vld [vmem:[%s6417_s1 + $0xf8] sm:$0xff] }
  0x21   :  { %3912 = vmatprep.mubr.msk.f32.mxu1 %vm727_vm1, %v345_v53  ;;  %4111 = vmatprep.mubr.msk.f32.mxu0 %vm727_vm1, %v139_v55  ;;  %v6422_v53 = vrot.slane %v4960_v47, 1  ;;  %v361_v55 = vrot.slane %v51_v39, 1  ;;  %v57_v39 = vld [vmem:[%s6416_s0 + $0x130] sm:$0x1] }
  0x23   :  { %v362_v13 = vsel %vm307_vm2, %v359_v37, %v361_v55  ;;  %v5005_v26 = vsel %vm307_vm2, %v614_v45, %v6422_v53  ;;  %v5024_v45 = vld [vmem:[%s6416_s0 + $0x140] sm:$0xff] }
  0x24   :  { %3913 = vmatmul.mubr.msk.f32.gmra.mrb[14].mxu1 %vm727_vm1, %v347_v0  ;;  %4112 = vmatmul.mubr.msk.f32.gmra.mrb[16].mxu0 %vm727_vm1, %v4888_v62  ;;  %v364_v0 = vrot.slane %v4952_v42, 1  ;;  %6491 = vst [vmem:[#allocation10_spill] sm:$0xff] %v5024_v45 }
  0x25   :  { %3915 = vmatprep.mubr.msk.f32.mxu1 %vm727_vm1, %v350_v8  ;;  %4114 = vmatprep.mubr.msk.f32.mxu0 %vm727_vm1, %v142_v9  ;;  %v4983_v8 = vld [vmem:[%s6416_s0 + $0x120] sm:$0xff]  ;;  %v4988_v9 = vld [vmem:[%s6416_s0 + $0x128] sm:$0xff] }
  0x26   :  { %v368_v36 = vrot.slane %v4983_v8, 1  ;;  %v369_v37 = vrot.slane %v4988_v9, 1 }
  0x28   :  { %3916 = vmatmul.mubr.msk.f32.gmra.mrb[16].mxu1 %vm727_vm1, %v352_v24  ;;  %4115 = vmatmul.mubr.msk.f32.gmra.mrb[18].mxu0 %vm727_vm1, %v4924_v23  ;;  %v366_v24 = vrot.slane %v54_v5, 1  ;;  %v371_v5 = vrot.slane %v57_v39, 1  ;;  %v370_v53 = vsel %vm307_vm2, %v368_v36, %v369_v37  ;;  %v629_v36 = vrot.slane %v154_v25, 1  ;;  %v5068_v39 = vld [vmem:[%s6417_s1 + $0x140] sm:$0xff] }
  0x29   :  { %3918 = vmatprep.mubr.msk.f32.mxu1 %vm727_vm1, %v355_v31  ;;  %4117 = vmatprep.mubr.msk.f32.mxu0 %vm727_vm1, %v145_v33  ;;  %v365_v31 = vsel %vm307_vm2, %v363_v61, %v364_v0  ;;  %v151_v33 = vld [vmem:[%s6417_s1 + $0x120] sm:$0xff]  ;;  %v6434_v2 = vrot.slane %v5068_v39, 1 }
  0x2a   :  { %v624_v55 = vrot.slane %v151_v33, 1 }
  0x2c   :  { %3919 = vmatmul.mubr.msk.f32.gmra.mrb[18].mxu1 %vm727_vm1, %v357_v49  ;;  %4118 = vmatmul.mubr.msk.f32.gmra.mrb[20].mxu0 %vm727_vm1, %v4960_v47  ;;  %v5019_v49 = vld [vmem:[%s6416_s0 + $0x138] sm:$0xff] }
  0x2d   :  { %3921 = vmatprep.mubr.msk.f32.mxu1 %vm727_vm1, %v360_v57  ;;  %4120 = vmatprep.mubr.msk.f32.mxu0 %vm727_vm1, %v148_v58  ;;  %6490 = vst [vmem:[#allocation9_spill] sm:$0xff] %v5019_v49  ;;  %v5032_v57 = vld [vmem:[%s6417_s1 + $0x128] sm:$0xff]  ;;  %v367_v58 = vsel %vm307_vm2, %v364_v0, %v366_v24  ;;  %v374_v0 = vrot.slane %v5024_v45, 1 }
  0x2e   :  { %v6429_v61 = vrot.slane %v5032_v57, 1  ;;  %v60_v24 = vld [vmem:[%s6416_s0 + $0x148] sm:$0x1] }
  0x2f   :  { %v376_v48 = vrot.slane %v60_v24, 1  ;;  %v5104_v24 = vld [vmem:[%s6417_s1 + $0x158] sm:$0xff]  ;;  %v172_v45 = vld [vmem:[%s6417_s1 + $0x1c8] sm:$0xff] }
  0x30   :  { %3922 = vmatmul.mubr.msk.f32.gmra.mrb[20].mxu1 %vm727_vm1, %v362_v13  ;;  %4121 = vmatmul.mubr.msk.f32.gmra.mrb[22].mxu0 %vm727_vm1, %v4996_v12  ;;  %v5041_v13 = vsel %vm307_vm2, %v619_v10, %v6424_v21  ;;  %v5060_v10 = vld [vmem:[%s6416_s0 + $0x158] sm:$0xff]  ;;  %v372_v21 = vsel %vm307_vm2, %v369_v37, %v371_v5  ;;  %v5091_v5 = vld [vmem:[%s6416_s0 + $0x168] sm:$0xff]  ;;  %6496 = vst [vmem:[#allocation15_spill] sm:$0xff] %v5104_v24 }
  0x31   :  { %3924 = vmatprep.mubr.msk.f32.mxu1 %vm727_vm1, %v365_v31  ;;  %4123 = vmatprep.mubr.msk.f32.mxu0 %vm727_vm1, %v151_v33  ;;  %v373_v31 = vrot.slane %v5019_v49, 1  ;;  %v5055_v33 = vld [vmem:[%s6416_s0 + $0x150] sm:$0xff]  ;;  %6493 = vst [vmem:[#allocation12_spill] sm:$0xff] %v5060_v10  ;;  %v379_v37 = vrot.slane %v5060_v10, 1  ;;  %6494 = vst [vmem:[#allocation13_spill] sm:$0xff] %v5091_v5  ;;  %v163_v10 = vld [vmem:[%s6417_s1 + $0x180] sm:$0xff] }
  0x32   :  { %6492 = vst [vmem:[#allocation11_spill] sm:$0xff] %v5055_v33 }
  0x33   :  { %v375_v32 = vsel %vm307_vm2, %v373_v31, %v374_v0  ;;  %v634_v31 = vrot.slane %v157_v17, 1 }
  0x34   :  { %3925 = vmatmul.mubr.msk.f32.gmra.mrb[22].mxu1 %vm727_vm1, %v367_v58  ;;  %4124 = vmatmul.mubr.msk.f32.gmra.mrb[24].mxu0 %vm727_vm1, %v5032_v57  ;;  %v5077_v58 = vsel %vm307_vm2, %v624_v55, %v6429_v61  ;;  %v5096_v55 = vld [vmem:[%s6416_s0 + $0x170] sm:$0xff]  ;;  %v377_v61 = vsel %vm307_vm2, %v374_v0, %v376_v48  ;;  %v5127_v0 = vld [vmem:[%s6416_s0 + $0x180] sm:$0xff] }
  0x35   :  { %3927 = vmatprep.mubr.msk.f32.mxu1 %vm727_vm1, %v370_v53  ;;  %4126 = vmatprep.mubr.msk.f32.mxu0 %vm727_vm1, %v154_v25  ;;  %v378_v53 = vrot.slane %v5055_v33, 1  ;;  %v63_v25 = vld [vmem:[%s6416_s0 + $0x160] sm:$0x1]  ;;  %6495 = vst [vmem:[#allocation14_spill] sm:$0xff] %v5096_v55  ;;  %v384_v48 = vrot.slane %v5096_v55, 1  ;;  %6497 = vst [vmem:[#allocation16_spill] sm:$0xff] %v5127_v0 }
  0x36   :  { %v381_v52 = vrot.slane %v63_v25, 1  ;;  %v5140_v25 = vld [vmem:[%s6417_s1 + $0x170] sm:$0xff] }
  0x37   :  { %v380_v38 = vsel %vm307_vm2, %v378_v53, %v379_v37  ;;  %v639_v53 = vrot.slane %v160_v18, 1  ;;  %6499 = vst [vmem:[#allocation18_spill] sm:$0xff] %v5140_v25  ;;  %v6441_v7 = vrot.slane %v5140_v25, 1 }
  0x38   :  { %3928 = vmatmul.mubr.msk.f32.gmra.mrb[24].mxu1 %vm727_vm1, %v372_v21  ;;  %4127 = vmatmul.mubr.msk.f32.gmra.mrb[26].mxu0 %vm727_vm1, %v5068_v39  ;;  %v5113_v21 = vsel %vm307_vm2, %v629_v36, %v6434_v2  ;;  %v5132_v36 = vld [vmem:[%s6416_s0 + $0x188] sm:$0xff]  ;;  %v382_v2 = vsel %vm307_vm2, %v379_v37, %v381_v52  ;;  %v5163_v37 = vld [vmem:[%s6416_s0 + $0x198] sm:$0xff] }
  0x39   :  { %3930 = vmatprep.mubr.msk.f32.mxu1 %vm727_vm1, %v375_v32  ;;  %4129 = vmatprep.mubr.msk.f32.mxu0 %vm727_vm1, %v157_v17  ;;  %v383_v32 = vrot.slane %v5091_v5, 1  ;;  %v66_v17 = vld [vmem:[%s6416_s0 + $0x178] sm:$0x1]  ;;  %6498 = vst [vmem:[#allocation17_spill] sm:$0xff] %v5132_v36  ;;  %v389_v52 = vrot.slane %v5132_v36, 1  ;;  %6502 = vst [vmem:[#allocation20_spill] sm:$0xff] %v5163_v37  ;;  %v5184_v36 = vsel %vm307_vm2, %v639_v53, %v6441_v7 }
  0x3a   :  { %v386_v1 = vrot.slane %v66_v17, 1  ;;  %v5179_v17 = vld [vmem:[%s6417_s1 + $0x188] sm:$0xff]  ;;  %6505 = vst [vmem:[#allocation23_spill] sm:$0xff] %v5184_v36  ;;  %v5203_v53 = vld [vmem:[%s6416_s0 + $0x1b8] sm:$0xff]  ;;  %v5214_v7 = vld [vmem:[%s6417_s1 + $0x1a0] sm:$0xff] }
  0x3b   :  { %v385_v5 = vsel %vm307_vm2, %v383_v32, %v384_v48  ;;  %6504 = vst [vmem:[#allocation22_spill] sm:$0xff] %v5179_v17  ;;  %6507 = vst [vmem:[#allocation25_spill] sm:$0xff] %v5203_v53 }
  0x3c   :  { %3931 = vmatmul.mubr.msk.f32.gmra.mrb[26].mxu1 %vm727_vm1, %v377_v61  ;;  %4130 = vmatmul.mubr.msk.f32.gmra.mrb[28].mxu0 %vm727_vm1, %v5104_v24  ;;  %v6500_v61 = vrot.slane %v5104_v24, 1  ;;  %v387_v32 = vsel %vm307_vm2, %v384_v48, %v386_v1  ;;  %v393_v1 = vrot.slane %v5163_v37, 1  ;;  %v5256_v24 = vld [vmem:[%s6417_s1 + $0x1d0] sm:$0xff] }
  0x3d   :  { %3933 = vmatprep.mubr.msk.f32.mxu1 %vm727_vm1, %v380_v38  ;;  %4132 = vmatprep.mubr.msk.f32.mxu0 %vm727_vm1, %v160_v18  ;;  %v388_v38 = vrot.slane %v5127_v0, 1  ;;  %v69_v18 = vld [vmem:[%s6416_s0 + $0x190] sm:$0x1]  ;;  %v72_v0 = vld [vmem:[%s6416_s0 + $0x1a8] sm:$0x1]  ;;  %6511 = vst [vmem:[#allocation29_spill] sm:$0xff] %v5256_v24 }
  0x3e   :  { %v5149_v55 = vsel %vm307_vm2, %v634_v31, %v6500_v61  ;;  %v5168_v31 = vld [vmem:[%s6416_s0 + $0x1a0] sm:$0xff]  ;;  %v391_v61 = vrot.slane %v69_v18, 1  ;;  %v5198_v18 = vld [vmem:[%s6416_s0 + $0x1b0] sm:$0xff] }
  0x3f   :  { %6501 = vst [vmem:[#allocation19_spill] sm:$0xff] %v5149_v55  ;;  %6503 = vst [vmem:[#allocation21_spill] sm:$0xff] %v5168_v31  ;;  %v394_v48 = vrot.slane %v5168_v31, 1  ;;  %v396_v31 = vrot.slane %v72_v0, 1  ;;  %v5229_v0 = vld [vmem:[%s6416_s0 + $0x1c8] sm:$0xff] }
  0x40   :  { %3934 = vmatmul.mubr.msk.f32.gmra.mrb[28].mxu1 %vm727_vm1, %v382_v2  ;;  %4133 = vmatmul.mubr.msk.f32.gmra.mrb[30].mxu0 %vm727_vm1, %v5140_v25  ;;  %v390_v2 = vsel %vm307_vm2, %v388_v38, %v389_v52  ;;  %6506 = vst [vmem:[#allocation24_spill] sm:$0xff] %v5198_v18  ;;  %v392_v38 = vsel %vm307_vm2, %v389_v52, %v391_v61  ;;  %v398_v25 = vrot.slane %v5198_v18, 1  ;;  %v75_v52 = vld [vmem:[%s6416_s0 + $0x1c0] sm:$0x1]  ;;  %v644_v61 = vrot.slane %v163_v10, 1 }
  0x41   :  { %3936 = vmatprep.mubr.msk.f32.mxu1 %vm727_vm1, %v385_v5  ;;  %4135 = vmatprep.mubr.msk.f32.mxu0 %vm727_vm1, %v163_v10  ;;  %v166_v5 = vld [vmem:[%s6417_s1 + $0x198] sm:$0xff]  ;;  %v395_v37 = vsel %vm307_vm2, %v393_v1, %v394_v48  ;;  %6508 = vst [vmem:[#allocation26_spill] sm:$0xff] %v5229_v0  ;;  %v5234_v1 = vld [vmem:[%s6416_s0 + $0x1d0] sm:$0xff]  ;;  %v397_v36 = vsel %vm307_vm2, %v394_v48, %v396_v31 }
  0x42   :  { %6509 = vst [vmem:[#allocation27_spill] sm:$0xff] %v5234_v1  ;;  %v5243_v10 = vld [vmem:[%s6417_s1 + $0x1b8] sm:$0xff]  ;;  %v404_v31 = vrot.slane %v5234_v1, 1 }
  0x43   :  { %6510 = vst [vmem:[#allocation28_spill] sm:$0xff] %v5243_v10  ;;  %v78_v48 = vld [vmem:[%s6416_s0 + $0x1d8] sm:$0x1] }
  0x44   :  { %3937 = vmatmul.mubr.msk.f32.gmra.mrb[30].mxu1 %vm727_vm1, %v387_v32  ;;  %4136 = vmatmul.mubr.msk.f32.gmra.mrb[32].mxu0 %vm727_vm1, %v5179_v17  ;;  %v169_v32 = vld [vmem:[%s6417_s1 + $0x1b0] sm:$0xff] }
  0x45   :  { %3939 = vmatprep.mubr.msk.f32.mxu1 %vm727_vm1, %v390_v2  ;;  %4138 = vmatprep.mubr.msk.f32.mxu0 %vm727_vm1, %v166_v5  ;;  %v399_v2 = vrot.slane %v5203_v53, 1  ;;  %v649_v53 = vrot.slane %v166_v5, 1  ;;  %v654_v33 = vrot.slane %v169_v32, 1  ;;  %v401_v5 = vrot.slane %v75_v52, 1 }
  0x46   :  { %v6514_v52 = vrot.slane %v5179_v17, 1 }
  0x47   :  { %v400_v18 = vsel %vm307_vm2, %v398_v25, %v399_v2  ;;  %v5266_v25 = vld [vmem:[%s6416_s0 + $0x1e0] sm:$0xff] }
  0x48   :  { %3940 = vmatmul.mubr.msk.f32.gmra.mrb[32].mxu1 %vm727_vm1, %v392_v38  ;;  %4139 = vmatmul.mubr.msk.f32.gmra.mrb[34].mxu0 %vm727_vm1, %v5214_v7  ;;  %6512 = vst [vmem:[#allocation30_spill] sm:$0xff] %v5266_v25  ;;  %v5276_v38 = vsel %vm307_vm2, %v644_v61, %v6514_v52 }
  0x49   :  { %3942 = vmatprep.mubr.msk.f32.mxu1 %vm727_vm1, %v395_v37  ;;  %4141 = vmatprep.mubr.msk.f32.mxu0 %vm727_vm1, %v169_v32  ;;  %v403_v37 = vrot.slane %v5229_v0, 1  ;;  %v5271_v32 = vld [vmem:[%s6416_s0 + $0x1e8] sm:$0xff]  ;;  %6515 = vst [vmem:[#allocation32_spill] sm:$0xff] %v5276_v38 }
  0x4a   :  { %6513 = vst [vmem:[#allocation31_spill] sm:$0xff] %v5271_v32 }
  0x4b   :  { %12 = vsyncpa [#allocation5], 0  ;;  %v659_v1 = vrot.slane %v172_v45, 1  ;;  %v6516_v55 = vrot.slane %v5214_v7, 1  ;;  %v402_v17 = vsel %vm307_vm2, %v399_v2, %v401_v5  ;;  %v406_v61 = vrot.slane %v78_v48, 1  ;;  %v175_v0 = vld [vmem:[%s6417_s1 + $0x1e0] sm:$0xff] }
  0x4c   :  { %3943 = vmatmul.mubr.msk.f32.gmra.mrb[34].mxu1 %vm727_vm1, %v397_v36  ;;  %4142 = vmatmul.mubr.msk.f32.gmra.mrb[36].mxu0 %vm727_vm1, %v5243_v10  ;;  %v6517_v36 = vrot.slane %v5243_v10, 1  ;;  %v405_v38 = vsel %vm307_vm2, %v403_v37, %v404_v31  ;;  %v5317_v2 = vld [vmem:[%s6416_s0 + $0x200] sm:$0xff]  ;;  %v664_v5 = vrot.slane %v175_v0, 1  ;;  %v6521_v48 = vrot.slane %v5256_v24, 1  ;;  %v178_v10 = vld [vmem:[%s6417_s1 + $0x1f8] sm:$0xff] }
  0x4d   :  { %v5285_v49 = vsel %vm307_vm2, %v649_v53, %v6516_v55  ;;  %3945 = vmatprep.mubr.msk.f32.mxu1 %vm727_vm1, %v400_v18  ;;  %4144 = vmatprep.mubr.msk.f32.mxu0 %vm727_vm1, %v172_v45  ;;  %v408_v55 = vrot.slane %v5266_v25, 1  ;;  %v409_v18 = vrot.slane %v5271_v32, 1  ;;  %v81_v45 = vld [vmem:[%s6416_s0 + $0x1f0] sm:$0x1]  ;;  %v5307_v53 = vld [vmem:[%s6417_s1 + $0x1e8] sm:$0xff]  ;;  %6520 = vst [vmem:[#allocation35_spill] sm:$0xff] %v5317_v2  ;;  %v407_v32 = vsel %vm307_vm2, %v404_v31, %v406_v61 }
  0x4e   :  { %v5293_v52 = vsel %vm307_vm2, %v654_v33, %v6517_v36  ;;  %6518 = vst [vmem:[#allocation33_spill] sm:$0xff] %v5307_v53  ;;  %v5312_v33 = vld [vmem:[%s6416_s0 + $0x1f8] sm:$0xff]  ;;  %v5326_v36 = vsel %vm307_vm2, %v659_v1, %v6521_v48  ;;  %v411_v25 = vrot.slane %v81_v45, 1  ;;  %v84_v1 = vld [vmem:[%s6416_s0 + $0x208] sm:$0x1]  ;;  %v669_v61 = vrot.slane %v178_v10, 1 }
  0x4f   :  { %6519 = vst [vmem:[#allocation34_spill] sm:$0xff] %v5312_v33  ;;  %6522 = vst [vmem:[#allocation36_spill] sm:$0xff] %v5326_v36  ;;  %v413_v37 = vrot.slane %v5312_v33, 1  ;;  %v5353_v31 = vld [vmem:[%s6416_s0 + $0x218] sm:$0xff]  ;;  %v6526_v45 = vrot.slane %v5307_v53, 1  ;;  %v416_v33 = vrot.slane %v84_v1, 1 }
  0x50   :  { %3946 = vmatmul.mubr.msk.f32.gmra.mrb[36].mxu1 %vm727_vm1, %v402_v17  ;;  %4145 = vmatmul.mubr.msk.f32.gmra.mrb[38].mxu0 %vm727_vm1, %v5256_v24  ;;  %v410_v17 = vsel %vm307_vm2, %v408_v55, %v409_v18  ;;  %v414_v24 = vrot.slane %v5317_v2, 1  ;;  %6525 = vst [vmem:[#allocation39_spill] sm:$0xff] %v5353_v31  ;;  %v412_v2 = vsel %vm307_vm2, %v409_v18, %v411_v25  ;;  %v181_v36 = vld [vmem:[%s6417_s1 + $0x210] sm:$0xff]  ;;  %v5379_v25 = vld [vmem:[%s6417_s1 + $0x218] sm:$0xff]  ;;  %vm2925_vm3 = vcmask 261120  }
  0x51   :  { %3948 = vmatprep.mubr.msk.f32.mxu1 %vm727_vm1, %v405_v38  ;;  %4147 = vmatprep.mubr.msk.f32.mxu0 %vm727_vm1, %v175_v0  ;;  %v5343_v38 = vld [vmem:[%s6417_s1 + $0x200] sm:$0xff]  ;;  %v5348_v0 = vld [vmem:[%s6416_s0 + $0x210] sm:$0xff]  ;;  %v5362_v48 = vsel %vm307_vm2, %v664_v5, %v6526_v45  ;;  %6528 = vst [vmem:[#allocation41_spill] sm:$0xff] %v5379_v25 }
  0x52   :  { %6523 = vst [vmem:[#allocation37_spill] sm:$0xff] %v5343_v38  ;;  %6524 = vst [vmem:[#allocation38_spill] sm:$0xff] %v5348_v0  ;;  %v418_v55 = vrot.slane %v5348_v0, 1  ;;  %v87_v5 = vld [vmem:[%s6416_s0 + $0x220] sm:$0x1]  ;;  %v5389_v18 = vld [vmem:[%s6416_s0 + $0x230] sm:$0xff] }
  0x53   :  { %6527 = vst [vmem:[#allocation40_spill] sm:$0xff] %v5362_v48  ;;  %6530 = vst [vmem:[#allocation43_spill] sm:$0xff] %v5389_v18  ;;  %v6531_v1 = vrot.slane %v5343_v38, 1  ;;  %v421_v0 = vrot.slane %v87_v5, 1  ;;  %v184_v48 = vld [vmem:[%s6417_s1 + $0x228] sm:$0xff]  ;;  %v6536_v5 = vrot.slane %v5379_v25, 1 }
  0x54   :  { %3949 = vmatmul.mubr.msk.f32.gmra.mrb[38].mxu1 %vm727_vm1, %v407_v32  ;;  %4148 = vmatmul.mubr.msk.f32.gmra.mrb[40].mxu0 %vm727_vm1, %v5307_v53  ;;  %v415_v32 = vsel %vm307_vm2, %v413_v37, %v414_v24  ;;  %v419_v53 = vrot.slane %v5353_v31, 1  ;;  %v674_v37 = vrot.slane %v181_v36, 1  ;;  %v417_v31 = vsel %vm307_vm2, %v414_v24, %v416_v33  ;;  %v5415_v24 = vld [vmem:[%s6417_s1 + $0x230] sm:$0xff]  ;;  %v5420_v33 = vld [vmem:[%s6416_s0 + $0x240] sm:$0xff] }
  0x55   :  { %3951 = vmatprep.mubr.msk.f32.mxu1 %vm727_vm1, %v410_v17  ;;  %4150 = vmatprep.mubr.msk.f32.mxu0 %vm727_vm1, %v178_v10  ;;  %v5384_v10 = vld [vmem:[%s6416_s0 + $0x228] sm:$0xff]  ;;  %v5398_v45 = vsel %vm307_vm2, %v669_v61, %v6531_v1  ;;  %v90_v61 = vld [vmem:[%s6416_s0 + $0x238] sm:$0x1]  ;;  %6533 = vst [vmem:[#allocation45_spill] sm:$0xff] %v5415_v24  ;;  %6534 = vst [vmem:[#allocation46_spill] sm:$0xff] %v5420_v33 }
  0x56   :  { %6529 = vst [vmem:[#allocation42_spill] sm:$0xff] %v5384_v10  ;;  %6532 = vst [vmem:[#allocation44_spill] sm:$0xff] %v5398_v45  ;;  %v423_v17 = vrot.slane %v5384_v10, 1  ;;  %v5434_v1 = vsel %vm307_vm2, %v674_v37, %v6536_v5  ;;  %v426_v10 = vrot.slane %v90_v61, 1  ;;  %v187_v45 = vld [vmem:[%s6417_s1 + $0x240] sm:$0xff]  ;;  %v6541_v61 = vrot.slane %v5415_v24, 1 }
  0x57   :  { %6537 = vst [vmem:[#allocation48_spill] sm:$0xff] %v5434_v1  ;;  %v93_v37 = vld [vmem:[%s6416_s0 + $0x250] sm:$0x1]  ;;  %v190_v1 = vld [vmem:[%s6417_s1 + $0x258] sm:$0xff] }
  0x58   :  { %3952 = vmatmul.mubr.msk.f32.gmra.mrb[40].mxu1 %vm727_vm1, %v412_v2  ;;  %4151 = vmatmul.mubr.msk.f32.gmra.mrb[42].mxu0 %vm727_vm1, %v5343_v38  ;;  %v420_v2 = vsel %vm307_vm2, %v418_v55, %v419_v53  ;;  %v424_v38 = vrot.slane %v5389_v18, 1  ;;  %v679_v55 = vrot.slane %v184_v48, 1  ;;  %v422_v18 = vsel %vm307_vm2, %v419_v53, %v421_v0  ;;  %v5451_v53 = vld [vmem:[%s6417_s1 + $0x248] sm:$0xff]  ;;  %v5456_v0 = vld [vmem:[%s6416_s0 + $0x258] sm:$0xff] }
  0x59   :  { %3954 = vmatprep.mubr.msk.f32.mxu1 %vm727_vm1, %v415_v32  ;;  %4153 = vmatprep.mubr.msk.f32.mxu0 %vm727_vm1, %v181_v36  ;;  %v5425_v36 = vld [vmem:[%s6416_s0 + $0x248] sm:$0xff]  ;;  %v428_v32 = vrot.slane %v5420_v33, 1  ;;  %6538 = vst [vmem:[#allocation49_spill] sm:$0xff] %v5451_v53  ;;  %6539 = vst [vmem:[#allocation50_spill] sm:$0xff] %v5456_v0  ;;  %v431_v33 = vrot.slane %v93_v37, 1  ;;  %v6546_v37 = vrot.slane %v5451_v53, 1 }
  0x5a   :  { %6535 = vst [vmem:[#allocation47_spill] sm:$0xff] %v5425_v36  ;;  %v5470_v5 = vsel %vm307_vm2, %v679_v55, %v6541_v61  ;;  %v96_v55 = vld [vmem:[%s6416_s0 + $0x268] sm:$0x1] }
  0x5b   :  { %6542 = vst [vmem:[#allocation52_spill] sm:$0xff] %v5470_v5  ;;  %v193_v5 = vld [vmem:[%s6417_s1 + $0x270] sm:$0xff] }
  0x5c   :  { %3955 = vmatmul.mubr.msk.f32.gmra.mrb[42].mxu1 %vm727_vm1, %v417_v31  ;;  %4154 = vmatmul.mubr.msk.f32.gmra.mrb[44].mxu0 %vm727_vm1, %v5379_v25  ;;  %v425_v31 = vsel %vm307_vm2, %v423_v17, %v424_v38  ;;  %v429_v25 = vrot.slane %v5425_v36, 1  ;;  %v684_v17 = vrot.slane %v187_v45, 1  ;;  %v427_v36 = vsel %vm307_vm2, %v424_v38, %v426_v10  ;;  %v5487_v38 = vld [vmem:[%s6417_s1 + $0x260] sm:$0xff]  ;;  %v5492_v10 = vld [vmem:[%s6416_s0 + $0x270] sm:$0xff] }
  0x5d   :  { %3957 = vmatprep.mubr.msk.f32.mxu1 %vm727_vm1, %v420_v2  ;;  %4156 = vmatprep.mubr.msk.f32.mxu0 %vm727_vm1, %v184_v48  ;;  %v5461_v48 = vld [vmem:[%s6416_s0 + $0x260] sm:$0xff]  ;;  %v433_v2 = vrot.slane %v5456_v0, 1  ;;  %6543 = vst [vmem:[#allocation53_spill] sm:$0xff] %v5487_v38  ;;  %6544 = vst [vmem:[#allocation54_spill] sm:$0xff] %v5492_v10  ;;  %v436_v0 = vrot.slane %v96_v55, 1  ;;  %v6551_v55 = vrot.slane %v5487_v38, 1 }
  0x5e   :  { %6540 = vst [vmem:[#allocation51_spill] sm:$0xff] %v5461_v48  ;;  %v5506_v61 = vsel %vm307_vm2, %v684_v17, %v6546_v37  ;;  %v99_v17 = vld [vmem:[%s6416_s0 + $0x280] sm:$0x1] }
  0x5f   :  { %6547 = vst [vmem:[#allocation56_spill] sm:$0xff] %v5506_v61  ;;  %v196_v61 = vld [vmem:[%s6417_s1 + $0x288] sm:$0xff] }
  0x60   :  { %3958 = vmatmul.mubr.msk.f32.gmra.mrb[44].mxu1 %vm727_vm1, %v422_v18  ;;  %4157 = vmatmul.mubr.msk.f32.gmra.mrb[46].mxu0 %vm727_vm1, %v5415_v24  ;;  %v430_v18 = vsel %vm307_vm2, %v428_v32, %v429_v25  ;;  %v434_v24 = vrot.slane %v5461_v48, 1  ;;  %v689_v32 = vrot.slane %v190_v1, 1  ;;  %v432_v48 = vsel %vm307_vm2, %v429_v25, %v431_v33  ;;  %v5523_v25 = vld [vmem:[%s6417_s1 + $0x278] sm:$0xff]  ;;  %v5528_v33 = vld [vmem:[%s6416_s0 + $0x288] sm:$0xff] }
  0x61   :  { %3960 = vmatprep.mubr.msk.f32.mxu1 %vm727_vm1, %v425_v31  ;;  %4159 = vmatprep.mubr.msk.f32.mxu0 %vm727_vm1, %v187_v45  ;;  %v5497_v45 = vld [vmem:[%s6416_s0 + $0x278] sm:$0xff]  ;;  %v438_v31 = vrot.slane %v5492_v10, 1  ;;  %6548 = vst [vmem:[#allocation57_spill] sm:$0xff] %v5523_v25  ;;  %6549 = vst [vmem:[#allocation58_spill] sm:$0xff] %v5528_v33  ;;  %v441_v10 = vrot.slane %v99_v17, 1  ;;  %v6556_v17 = vrot.slane %v5523_v25, 1 }
  0x62   :  { %6545 = vst [vmem:[#allocation55_spill] sm:$0xff] %v5497_v45  ;;  %v5542_v37 = vsel %vm307_vm2, %v689_v32, %v6551_v55  ;;  %v102_v32 = vld [vmem:[%s6416_s0 + $0x298] sm:$0x1] }
  0x63   :  { %6552 = vst [vmem:[#allocation60_spill] sm:$0xff] %v5542_v37  ;;  %v199_v37 = vld [vmem:[%s6417_s1 + $0x2a0] sm:$0xff] }
  0x64   :  { %3961 = vmatmul.mubr.msk.f32.gmra.mrb[46].mxu1 %vm727_vm1, %v427_v36  ;;  %4160 = vmatmul.mubr.msk.f32.gmra.mrb[48].mxu0 %vm727_vm1, %v5451_v53  ;;  %v435_v36 = vsel %vm307_vm2, %v433_v2, %v434_v24  ;;  %v439_v53 = vrot.slane %v5497_v45, 1  ;;  %v694_v2 = vrot.slane %v193_v5, 1  ;;  %v437_v45 = vsel %vm307_vm2, %v434_v24, %v436_v0  ;;  %v5559_v24 = vld [vmem:[%s6417_s1 + $0x290] sm:$0xff]  ;;  %v5564_v0 = vld [vmem:[%s6416_s0 + $0x2a0] sm:$0xff] }
  0x65   :  { %3963 = vmatprep.mubr.msk.f32.mxu1 %vm727_vm1, %v430_v18  ;;  %4162 = vmatprep.mubr.msk.f32.mxu0 %vm727_vm1, %v190_v1  ;;  %v5533_v1 = vld [vmem:[%s6416_s0 + $0x290] sm:$0xff]  ;;  %v443_v18 = vrot.slane %v5528_v33, 1  ;;  %6553 = vst [vmem:[#allocation61_spill] sm:$0xff] %v5559_v24  ;;  %6554 = vst [vmem:[#allocation62_spill] sm:$0xff] %v5564_v0  ;;  %v446_v33 = vrot.slane %v102_v32, 1  ;;  %v6561_v32 = vrot.slane %v5559_v24, 1 }
  0x66   :  { %6550 = vst [vmem:[#allocation59_spill] sm:$0xff] %v5533_v1  ;;  %v5578_v55 = vsel %vm307_vm2, %v694_v2, %v6556_v17  ;;  %v105_v2 = vld [vmem:[%s6416_s0 + $0x2b0] sm:$0x1] }
  0x67   :  { %6557 = vst [vmem:[#allocation64_spill] sm:$0xff] %v5578_v55  ;;  %v202_v55 = vld [vmem:[%s6417_s1 + $0x2b8] sm:$0xff] }
  0x68   :  { %3964 = vmatmul.mubr.msk.f32.gmra.mrb[48].mxu1 %vm727_vm1, %v432_v48  ;;  %4163 = vmatmul.mubr.msk.f32.gmra.mrb[50].mxu0 %vm727_vm1, %v5487_v38  ;;  %v440_v48 = vsel %vm307_vm2, %v438_v31, %v439_v53  ;;  %v444_v38 = vrot.slane %v5533_v1, 1  ;;  %v699_v31 = vrot.slane %v196_v61, 1  ;;  %v442_v1 = vsel %vm307_vm2, %v439_v53, %v441_v10  ;;  %v5595_v53 = vld [vmem:[%s6417_s1 + $0x2a8] sm:$0xff]  ;;  %v5600_v10 = vld [vmem:[%s6416_s0 + $0x2b8] sm:$0xff] }
  0x69   :  { %3966 = vmatprep.mubr.msk.f32.mxu1 %vm727_vm1, %v435_v36  ;;  %4165 = vmatprep.mubr.msk.f32.mxu0 %vm727_vm1, %v193_v5  ;;  %v5569_v5 = vld [vmem:[%s6416_s0 + $0x2a8] sm:$0xff]  ;;  %v448_v36 = vrot.slane %v5564_v0, 1  ;;  %6558 = vst [vmem:[#allocation65_spill] sm:$0xff] %v5595_v53  ;;  %6559 = vst [vmem:[#allocation66_spill] sm:$0xff] %v5600_v10  ;;  %v451_v0 = vrot.slane %v105_v2, 1  ;;  %v6566_v2 = vrot.slane %v5595_v53, 1 }
  0x6a   :  { %6555 = vst [vmem:[#allocation63_spill] sm:$0xff] %v5569_v5  ;;  %v5614_v17 = vsel %vm307_vm2, %v699_v31, %v6561_v32  ;;  %v108_v31 = vld [vmem:[%s6416_s0 + $0x2c8] sm:$0x1] }
  0x6b   :  { %6562 = vst [vmem:[#allocation68_spill] sm:$0xff] %v5614_v17  ;;  %v205_v17 = vld [vmem:[%s6417_s1 + $0x2d0] sm:$0xff] }
  0x6c   :  { %3967 = vmatmul.mubr.msk.f32.gmra.mrb[50].mxu1 %vm727_vm1, %v437_v45  ;;  %4166 = vmatmul.mubr.msk.f32.gmra.mrb[52].mxu0 %vm727_vm1, %v5523_v25  ;;  %v445_v45 = vsel %vm307_vm2, %v443_v18, %v444_v38  ;;  %v449_v25 = vrot.slane %v5569_v5, 1  ;;  %v704_v18 = vrot.slane %v199_v37, 1  ;;  %v447_v5 = vsel %vm307_vm2, %v444_v38, %v446_v33  ;;  %v5631_v38 = vld [vmem:[%s6417_s1 + $0x2c0] sm:$0xff]  ;;  %v5636_v33 = vld [vmem:[%s6416_s0 + $0x2d0] sm:$0xff] }
  0x6d   :  { %3969 = vmatprep.mubr.msk.f32.mxu1 %vm727_vm1, %v440_v48  ;;  %4168 = vmatprep.mubr.msk.f32.mxu0 %vm727_vm1, %v196_v61  ;;  %v5605_v61 = vld [vmem:[%s6416_s0 + $0x2c0] sm:$0xff]  ;;  %v453_v48 = vrot.slane %v5600_v10, 1  ;;  %6563 = vst [vmem:[#allocation69_spill] sm:$0xff] %v5631_v38  ;;  %6564 = vst [vmem:[#allocation70_spill] sm:$0xff] %v5636_v33  ;;  %v456_v10 = vrot.slane %v108_v31, 1  ;;  %v6570_v31 = vrot.slane %v5631_v38, 1 }
  0x6e   :  { %6560 = vst [vmem:[#allocation67_spill] sm:$0xff] %v5605_v61  ;;  %v5650_v32 = vsel %vm307_vm2, %v704_v18, %v6566_v2  ;;  %v111_v18 = vld [vmem:[%s6416_s0 + $0x2e0] sm:$0x1] }
  0x6f   :  { %6567 = vst [vmem:[#allocation72_spill] sm:$0xff] %v5650_v32 }
  0x70   :  { %3970 = vmatmul.mubr.msk.f32.gmra.mrb[52].mxu1 %vm727_vm1, %v442_v1  ;;  %4169 = vmatmul.mubr.msk.f32.gmra.mrb[54].mxu0 %vm727_vm1, %v5559_v24  ;;  %v450_v1 = vsel %vm307_vm2, %v448_v36, %v449_v25  ;;  %v454_v24 = vrot.slane %v5605_v61, 1  ;;  %v709_v36 = vrot.slane %v202_v55, 1  ;;  %v452_v61 = vsel %vm307_vm2, %v449_v25, %v451_v0  ;;  %v5667_v25 = vld [vmem:[%s6417_s1 + $0x2d8] sm:$0xff]  ;;  %v5672_v0 = vld [vmem:[%s6416_s0 + $0x2e8] sm:$0xff] }
  0x71   :  { %3972 = vmatprep.mubr.msk.f32.mxu1 %vm727_vm1, %v445_v45  ;;  %4171 = vmatprep.mubr.msk.f32.mxu0 %vm727_vm1, %v199_v37  ;;  %v5641_v37 = vld [vmem:[%s6416_s0 + $0x2d8] sm:$0xff]  ;;  %v458_v45 = vrot.slane %v5636_v33, 1  ;;  %6568 = vst [vmem:[#allocation73_spill] sm:$0xff] %v5672_v0  ;;  %v461_v33 = vrot.slane %v111_v18, 1 }
  0x72   :  { %6565 = vst [vmem:[#allocation71_spill] sm:$0xff] %v5641_v37  ;;  %v5686_v2 = vsel %vm307_vm2, %v709_v36, %v6570_v31  ;;  %v114_v36 = vld [vmem:[%s6416_s0 + $0x2f8] sm:$0x1] }
  0x73   :  { %6571 = vst [vmem:[#allocation75_spill] sm:$0xff] %v5686_v2  ;;  %v120_v2 = vld [vmem:[%s6417_s1 + $0x28] sm:$0x1] }
  0x74   :  { %3973 = vmatmul.mubr.msk.f32.gmra.mrb[54].mxu1 %vm727_vm1, %v447_v5  ;;  %4172 = vmatmul.mubr.msk.f32.gmra.mrb[56].mxu0 %vm727_vm1, %v5595_v53  ;;  %v455_v5 = vsel %vm307_vm2, %v453_v48, %v454_v24  ;;  %v459_v53 = vrot.slane %v5641_v37, 1  ;;  %v714_v48 = vrot.slane %v205_v17, 1  ;;  %v457_v37 = vsel %vm307_vm2, %v454_v24, %v456_v10  ;;  %v117_v24 = vld [vmem:[%s6417_s1 + $0x10] sm:$0x1] }
  0x75   :  { %3975 = vmatprep.mubr.msk.f32.mxu1 %vm727_vm1, %v450_v1  ;;  %4174 = vmatprep.mubr.msk.f32.mxu0 %vm727_vm1, %v202_v55  ;;  %v5677_v55 = vld [vmem:[%s6416_s0 + $0x2f0] sm:$0xff]  ;;  %v463_v1 = vrot.slane %v5672_v0, 1  ;;  %v567_v0 = vrot.slane %v117_v24, 1 }
  0x76   :  { %6569 = vst [vmem:[#allocation74_spill] sm:$0xff] %v5677_v55  ;;  %v460_v32 = vsel %vm307_vm2, %v458_v45, %v459_v53  ;;  %v5706_v10 = vld [vmem:[%s6417_s1 + $0x2f0] sm:$0xff]  ;;  %v462_v31 = vsel %vm307_vm2, %v459_v53, %v461_v33  ;;  %v6573_v33 = vrot.slane %v4610_v4, 1  ;;  %v6574_v4 = vrot.slane %v4639_v15, 1 }
  0x77   :  { %v720_v45 = vrot.slane %v5706_v10, 1  ;;  %v6575_v15 = vrot.slane %v4682_v34, 1  ;;  %v6576_v34 = vrot.slane %v4719_v50, 1  ;;  %v6577_v50 = vrot.slane %v4749_v63, 1 }
  0x78   :  { %3976 = vmatmul.mubr.msk.f32.gmra.mrb[56].mxu1 %vm727_vm1, %v452_v61  ;;  %4175 = vmatmul.mubr.msk.f32.gmra.mrb[58].mxu0 %vm727_vm1, %v5631_v38  ;;  %v208_v61 = vld [vmem:[%s6417_s1 + $0x2e8] sm:$0xff]  ;;  %v464_v38 = vrot.slane %v5677_v55, 1  ;;  %v466_v55 = vrot.slane %v114_v36, 1  ;;  %v6578_v63 = vrot.slane %v4781_v14, 1  ;;  %v6579_v14 = vrot.slane %v4816_v30, 1 }
  0x79   :  { %3978 = vmatprep.mubr.msk.f32.mxu1 %vm727_vm1, %v455_v5  ;;  %4177 = vmatprep.mubr.msk.f32.mxu0 %vm727_vm1, %v205_v17  ;;  %v719_v17 = vrot.slane %v208_v61, 1  ;;  %v6572_v5 = vrot.slane %v5667_v25, 1  ;;  %v6580_v30 = vrot.slane %v4852_v46, 1 }
  0x7a   :  { %v467_v53 = vsel %vm307_vm2, %v464_v38, %v466_v55  ;;  %v126_v55 = vld [vmem:[%s6417_s1 + $0x58] sm:$0x1] }
  0x7b   :  { %v5715_v18 = vsel %vm307_vm2, %v714_v48, %v6572_v5  ;;  %v568_v48 = vsel %vm307_vm2, %v6573_v33, %v567_v0  ;;  %v582_v24 = vrot.slane %v126_v55, 1  ;;  %v4481_v5 = vld [vmem:[%s6416_s0 + $0x20] sm:$0xff]  ;;  %v4483_v33 = vld [vmem:[%s6416_s0 + $0x38] sm:$0xff]  ;;  %v4487_v55 = vld [vmem:[%s6416_s0 + $0x68] sm:$0xff] }
  0x7c   :  { %3979 = vmatmul.mubr.msk.f32.gmra.mrb[58].mxu1 %vm727_vm1, %v457_v37  ;;  %4178 = vmatmul.mubr.msk.f32.gmra.mrb[60].mxu0 %vm727_vm1, %v5667_v25  ;;  %v465_v37 = vsel %vm307_vm2, %v463_v1, %v464_v38  ;;  %v572_v1 = vrot.slane %v120_v2, 1  ;;  %v4478_v38 = vld [vmem:[%s6416_s0] sm:$0xff]  ;;  %v4479_v2 = vld [vmem:[%s6416_s0 + $0x8] sm:$0xff] }
  0x7d   :  { %3981 = vmatprep.mubr.msk.f32.mxu1 %vm727_vm1, %v460_v32  ;;  %4180 = vmatprep.mubr.msk.f32.mxu0 %vm727_vm1, %v208_v61  ;;  %v5730_v32 = vsel %vm307_vm2, %v719_v17, %v720_v45  ;;  %v123_v61 = vld [vmem:[%s6417_s1 + $0x40] sm:$0x1]  ;;  %v129_v17 = vld [vmem:[%s6417_s1 + $0x70] sm:$0x1] }
  0x7e   :  { %v577_v0 = vrot.slane %v123_v61, 1  ;;  %v135_v61 = vld [vmem:[%s6417_s1 + $0xa0] sm:$0x1] }
  0x80   :  { %3982 = vmatmul.mubr.msk.f32.gmra.mrb[60].mxu1 %vm727_vm1, %v462_v31  ;;  %4181 = vmatmul.mubr.msk.f32.gmra.mrb[62].mxu0 %vm727_vm1, %v5706_v10  ;;  %v578_v36 = vsel %vm307_vm2, %v6575_v15, %v577_v0  ;;  %v583_v31 = vsel %vm307_vm2, %v6576_v34, %v582_v24  ;;  %v138_v0 = vld [vmem:[%s6417_s1 + $0xb8] sm:$0x1]  ;;  %v141_v15 = vld [vmem:[%s6417_s1 + $0xd0] sm:$0x1] }
  0x81   :  { %3984 = vmatprep.mubr.msk.f32.mxu1 %vm727_vm1, %v465_v37  ;;  %4185 = vmatprep.mubr.msk.f32.mxu0 %vm727_vm1, %v4657_v22  ;;  %v573_v22 = vsel %vm307_vm2, %v6574_v4, %v572_v1  ;;  %v587_v37 = vrot.slane %v129_v17, 1  ;;  %v607_v24 = vrot.slane %v141_v15, 1  ;;  %v144_v17 = vld [vmem:[%s6417_s1 + $0xe8] sm:$0x1]  ;;  %v150_v34 = vld [vmem:[%s6417_s1 + $0x118] sm:$0x1] }
  0x82   :  { %v6603_v15 = vrot.slane %v5214_v7, 1 }
  0x84   :  { %3985 = vmatmul.mubr.msk.f32.gmra.mrb[62].mxu1 %vm727_vm1, %v467_v53  ;;  %4186 = vmatmul.mubr.msk.f32.vlgmr.msra.gmra.mrb[0].mxu0 %vm727_vm1, %v568_v48  ;;  %v132_v53 = vld [vmem:[%s6417_s1 + $0x88] sm:$0x1]  ;;  %v588_v48 = vsel %vm307_vm2, %v6577_v50, %v587_v37  ;;  %v6594_v50 = vld [vmem:[#allocation18_spill] sm:$0xff] }
  0x85   :  { %3989 = vmatprep.mubr.msk.f32.mxu1 %vm727_vm1, %v4478_v38  ;;  %4188 = vmatprep.mubr.msk.f32.mxu0 %vm727_vm1, %v4697_v41  ;;  %v4480_v41 = vld [vmem:[%s6416_s0 + $0x18] sm:$0xff]  ;;  %v592_v1 = vrot.slane %v132_v53, 1  ;;  %v4485_v38 = vld [vmem:[%s6416_s0 + $0x50] sm:$0xff] }
  0x86   :  { %v165_v53 = vld [vmem:[%s6417_s1 + $0x190] sm:$0x1] }
  0x87   :  { %v593_v4 = vsel %vm307_vm2, %v6578_v63, %v592_v1  ;;  %v6597_v63 = vld [vmem:[#allocation13_spill] sm:$0xff] }
  0x88   :  { %3990 = vmatmul.mubr.msk.f32.vlgmr.msra.gmra.mrb[0].mxu1 %vm727_vm1, %v4479_v2  ;;  %4189 = vmatmul.mubr.msk.f32.gmra.mrb[2].mxu0 %vm727_vm1, %v573_v22  ;;  %v597_v22 = vrot.slane %v135_v61, 1  ;;  %v647_v61 = vrot.slane %v165_v53, 1 }
  0x89   :  { %3992 = vmatprep.mubr.msk.f32.mxu1 %vm727_vm1, %v4480_v41  ;;  %4191 = vmatprep.mubr.msk.f32.mxu0 %vm727_vm1, %v4728_v54  ;;  %v4482_v54 = vld [vmem:[%s6416_s0 + $0x30] sm:$0xff]  ;;  %v602_v41 = vrot.slane %v138_v0, 1 }
  0x8a   :  { %v598_v2 = vsel %vm307_vm2, %v6579_v14, %v597_v22  ;;  %v6599_v22 = vld [vmem:[#allocation22_spill] sm:$0xff]  ;;  %v171_v14 = vld [vmem:[%s6417_s1 + $0x1c0] sm:$0x1] }
  0x8b   :  { %v6600_v0 = vrot.slane %v6599_v22, 1  ;;  %v6634_v22 = vld [vmem:[#allocation42_spill] sm:$0xff] }
  0x8c   :  { %3993 = vmatmul.mubr.msk.f32.gmra.mrb[2].mxu1 %vm727_vm1, %v4481_v5  ;;  %4192 = vmatmul.mubr.msk.f32.gmra.mrb[4].mxu0 %vm727_vm1, %v578_v36  ;;  %v4489_v36 = vld [vmem:[%s6416_s0 + $0x80] sm:$0xff]  ;;  %v4490_v5 = vld [vmem:[%s6416_s0 + $0x98] sm:$0xff] }
  0x8d   :  { %3995 = vmatprep.mubr.msk.f32.mxu1 %vm727_vm1, %v4482_v54  ;;  %4194 = vmatprep.mubr.msk.f32.mxu0 %vm727_vm1, %v4758_v3  ;;  %v4484_v3 = vld [vmem:[%s6416_s0 + $0x48] sm:$0xff]  ;;  %v147_v54 = vld [vmem:[%s6417_s1 + $0x100] sm:$0x1] }
  0x90   :  { %3996 = vmatmul.mubr.msk.f32.gmra.mrb[4].mxu1 %vm727_vm1, %v4483_v33  ;;  %4195 = vmatmul.mubr.msk.f32.gmra.mrb[6].mxu0 %vm727_vm1, %v583_v31  ;;  %v6591_v33 = vld [vmem:[#allocation10_spill] sm:$0xff] }
  0x91   :  { %3998 = vmatprep.mubr.msk.f32.mxu1 %vm727_vm1, %v4484_v3  ;;  %4197 = vmatprep.mubr.msk.f32.mxu0 %vm727_vm1, %v4790_v20  ;;  %v4486_v20 = vld [vmem:[%s6416_s0 + $0x60] sm:$0xff]  ;;  %v6593_v3 = vld [vmem:[#allocation23_spill] sm:$0xff] }
  0x94   :  { %3999 = vmatmul.mubr.msk.f32.gmra.mrb[6].mxu1 %vm727_vm1, %v4485_v38  ;;  %4198 = vmatmul.mubr.msk.f32.gmra.mrb[8].mxu0 %vm727_vm1, %v588_v48  ;;  %v6595_v48 = vrot.slane %v6594_v50, 1  ;;  %v168_v38 = vld [vmem:[%s6417_s1 + $0x1a8] sm:$0x1]  ;;  %v6629_v50 = vld [vmem:[#allocation38_spill] sm:$0xff] }
  0x95   :  { %4001 = vmatprep.mubr.msk.f32.mxu1 %vm727_vm1, %v4486_v20  ;;  %4200 = vmatprep.mubr.msk.f32.mxu0 %vm727_vm1, %v4825_v35  ;;  %v4488_v35 = vld [vmem:[%s6416_s0 + $0x78] sm:$0xff] }
  0x96   :  { %v6596_v20 = vld [vmem:[#allocation12_spill] sm:$0xff] }
  0x98   :  { %4002 = vmatmul.mubr.msk.f32.gmra.mrb[8].mxu1 %vm727_vm1, %v4487_v55  ;;  %4201 = vmatmul.mubr.msk.f32.gmra.mrb[10].mxu0 %vm727_vm1, %v593_v4  ;;  %v6598_v4 = vld [vmem:[#allocation32_spill] sm:$0xff]  ;;  %v648_v55 = vsel %vm307_vm2, %v6600_v0, %v647_v61 }
  0x99   :  { %4004 = vmatprep.mubr.msk.f32.mxu1 %vm727_vm1, %v4488_v35  ;;  %4203 = vmatprep.mubr.msk.f32.mxu0 %vm727_vm1, %v4861_v51  ;;  %v603_v51 = vsel %vm307_vm2, %v6580_v30, %v602_v41  ;;  %v652_v35 = vrot.slane %v168_v38, 1  ;;  %v6602_v41 = vld [vmem:[#allocation16_spill] sm:$0xff]  ;;  %v657_v30 = vrot.slane %v171_v14, 1 }
  0x9a   :  { %v6635_v0 = vld [vmem:[#allocation56_spill] sm:$0xff] }
  0x9c   :  { %4005 = vmatmul.mubr.msk.f32.gmra.mrb[10].mxu1 %vm727_vm1, %v4489_v36  ;;  %4204 = vmatmul.mubr.msk.f32.gmra.mrb[12].mxu0 %vm727_vm1, %v598_v2  ;;  %v6601_v2 = vld [vmem:[#allocation14_spill] sm:$0xff]  ;;  %v653_v36 = vsel %vm307_vm2, %v6603_v15, %v652_v35  ;;  %v6638_v15 = vld [vmem:[#allocation43_spill] sm:$0xff] }
  0x9d   :  { %4007 = vmatprep.mubr.msk.f32.mxu1 %vm727_vm1, %v4770_v11  ;;  %4206 = vmatprep.mubr.msk.f32.mxu0 %vm727_vm1, %v4897_v6  ;;  %v6581_v11 = vrot.slane %v4888_v62, 1  ;;  %v612_v6 = vrot.slane %v144_v17, 1  ;;  %v6605_v17 = vld [vmem:[#allocation20_spill] sm:$0xff] }
  0x9f   :  { %v608_v46 = vsel %vm307_vm2, %v6581_v11, %v607_v24  ;;  %v6604_v24 = vld [vmem:[#allocation17_spill] sm:$0xff] }
  0xa0   :  { %4008 = vmatmul.mubr.msk.f32.gmra.mrb[12].mxu1 %vm727_vm1, %v4490_v5  ;;  %4207 = vmatmul.mubr.msk.f32.gmra.mrb[14].mxu0 %vm727_vm1, %v603_v51  ;;  %v174_v51 = vld [vmem:[%s6417_s1 + $0x1d8] sm:$0x1] }
  0xa1   :  { %4010 = vmatprep.mubr.msk.f32.mxu1 %vm727_vm1, %v4803_v27  ;;  %4209 = vmatprep.mubr.msk.f32.mxu0 %vm727_vm1, %v4933_v29  ;;  %v6582_v27 = vrot.slane %v4924_v23, 1  ;;  %v617_v29 = vrot.slane %v147_v54, 1  ;;  %v622_v23 = vrot.slane %v150_v34, 1  ;;  %v662_v11 = vrot.slane %v174_v51, 1  ;;  %v6609_v54 = vld [vmem:[#allocation24_spill] sm:$0xff]  ;;  %v6641_v51 = vld [vmem:[#allocation53_spill] sm:$0xff] }
  0xa3   :  { %v613_v62 = vsel %vm307_vm2, %v6582_v27, %v612_v6  ;;  %v6608_v6 = vld [vmem:[#allocation21_spill] sm:$0xff]  ;;  %v6610_v27 = vld [vmem:[#allocation36_spill] sm:$0xff] }
  0xa4   :  { %4011 = vmatmul.mubr.msk.f32.gmra.mrb[14].mxu1 %vm727_vm1, %v4808_v28  ;;  %4210 = vmatmul.mubr.msk.f32.gmra.mrb[16].mxu0 %vm727_vm1, %v608_v46  ;;  %v6583_v28 = vrot.slane %v4960_v47, 1  ;;  %v177_v46 = vld [vmem:[%s6417_s1 + $0x1f0] sm:$0x1] }
  0xa5   :  { %4013 = vmatprep.mubr.msk.f32.mxu1 %vm727_vm1, %v4839_v43  ;;  %4212 = vmatprep.mubr.msk.f32.mxu0 %vm727_vm1, %v4969_v56  ;;  %v153_v56 = vld [vmem:[%s6417_s1 + $0x130] sm:$0x1]  ;;  %v667_v34 = vrot.slane %v177_v46, 1  ;;  %v6645_v46 = vld [vmem:[#allocation64_spill] sm:$0xff] }
  0xa6   :  { %v618_v43 = vsel %vm307_vm2, %v6583_v28, %v617_v29  ;;  %v627_v47 = vrot.slane %v153_v56, 1  ;;  %v180_v28 = vld [vmem:[%s6417_s1 + $0x208] sm:$0x1]  ;;  %v6615_v56 = vld [vmem:[#allocation40_spill] sm:$0xff] }
  0xa8   :  { %4014 = vmatmul.mubr.msk.f32.gmra.mrb[16].mxu1 %vm727_vm1, %v4844_v44  ;;  %4213 = vmatmul.mubr.msk.f32.gmra.mrb[18].mxu0 %vm727_vm1, %v613_v62  ;;  %v6584_v44 = vrot.slane %v4996_v12, 1 }
  0xa9   :  { %4016 = vmatprep.mubr.msk.f32.mxu1 %vm727_vm1, %v4875_v59  ;;  %4215 = vmatprep.mubr.msk.f32.mxu0 %vm727_vm1, %v5005_v26  ;;  %v156_v26 = vld [vmem:[%s6417_s1 + $0x148] sm:$0x1] }
  0xaa   :  { %v623_v59 = vsel %vm307_vm2, %v6584_v44, %v622_v23  ;;  %v632_v12 = vrot.slane %v156_v26, 1  ;;  %v6614_v23 = vld [vmem:[#allocation26_spill] sm:$0xff]  ;;  %v6616_v44 = vld [vmem:[#allocation33_spill] sm:$0xff]  ;;  %v672_v26 = vrot.slane %v180_v28, 1  ;;  %v6650_v28 = vld [vmem:[#allocation68_spill] sm:$0xff] }
  0xac   :  { %4017 = vmatmul.mubr.msk.f32.gmra.mrb[18].mxu1 %vm727_vm1, %v4880_v60  ;;  %4216 = vmatmul.mubr.msk.f32.gmra.mrb[20].mxu0 %vm727_vm1, %v618_v43  ;;  %v6585_v60 = vrot.slane %v5032_v57, 1  ;;  %v6613_v43 = vld [vmem:[#allocation25_spill] sm:$0xff] }
  0xad   :  { %4019 = vmatprep.mubr.msk.f32.mxu1 %vm727_vm1, %v4911_v16  ;;  %4218 = vmatprep.mubr.msk.f32.mxu0 %vm727_vm1, %v5041_v13  ;;  %v159_v13 = vld [vmem:[%s6417_s1 + $0x160] sm:$0x1] }
  0xae   :  { %v628_v16 = vsel %vm307_vm2, %v6585_v60, %v627_v47  ;;  %v637_v57 = vrot.slane %v159_v13, 1  ;;  %v183_v60 = vld [vmem:[%s6417_s1 + $0x220] sm:$0x1] }
  0xaf   :  { %v6620_v13 = vld [vmem:[#allocation44_spill] sm:$0xff] }
  0xb0   :  { %4020 = vmatmul.mubr.msk.f32.gmra.mrb[20].mxu1 %vm727_vm1, %v4916_v19  ;;  %4219 = vmatmul.mubr.msk.f32.gmra.mrb[22].mxu0 %vm727_vm1, %v623_v59  ;;  %v6586_v19 = vrot.slane %v5068_v39, 1  ;;  %v6617_v59 = vrot.slane %v6616_v44, 1 }
  0xb1   :  { %4022 = vmatprep.mubr.msk.f32.mxu1 %vm727_vm1, %v4947_v40  ;;  %4221 = vmatprep.mubr.msk.f32.mxu0 %vm727_vm1, %v5077_v58  ;;  %v162_v58 = vld [vmem:[%s6417_s1 + $0x178] sm:$0x1] }
  0xb2   :  { %v633_v40 = vsel %vm307_vm2, %v6586_v19, %v632_v12  ;;  %v642_v37 = vrot.slane %v162_v58, 1  ;;  %v668_v47 = vsel %vm307_vm2, %v6617_v59, %v667_v34  ;;  %v6619_v12 = vld [vmem:[#allocation30_spill] sm:$0xff]  ;;  %v6621_v19 = vld [vmem:[#allocation37_spill] sm:$0xff]  ;;  %v677_v58 = vrot.slane %v183_v60, 1  ;;  %v6655_v60 = vld [vmem:[#allocation72_spill] sm:$0xff] }
  0xb3   :  { %v6649_v34 = vld [vmem:[#allocation54_spill] sm:$0xff]  ;;  %v204_v59 = vld [vmem:[%s6417_s1 + $0x2c8] sm:$0x1] }
  0xb4   :  { %4023 = vmatmul.mubr.msk.f32.gmra.mrb[22].mxu1 %vm727_vm1, %v4952_v42  ;;  %4222 = vmatmul.mubr.msk.f32.gmra.mrb[24].mxu0 %vm727_vm1, %v628_v16  ;;  %v6587_v42 = vld [vmem:[#allocation9_spill] sm:$0xff]  ;;  %v643_v1 = vsel %vm307_vm2, %v6595_v48, %v642_v37  ;;  %v6618_v16 = vld [vmem:[#allocation27_spill] sm:$0xff]  ;;  %v6630_v48 = vld [vmem:[#allocation52_spill] sm:$0xff] }
  0xb5   :  { %4025 = vmatprep.mubr.msk.f32.mxu1 %vm727_vm1, %v4983_v8  ;;  %4224 = vmatprep.mubr.msk.f32.mxu0 %vm727_vm1, %v5113_v21  ;;  %v6588_v8 = vld [vmem:[#allocation19_spill] sm:$0xff] }
  0xb6   :  { %v6589_v21 = vld [vmem:[#allocation15_spill] sm:$0xff] }
  0xb7   :  { %v6590_v39 = vrot.slane %v6589_v21, 1  ;;  %v6624_v21 = vld [vmem:[#allocation34_spill] sm:$0xff] }
  0xb8   :  { %4026 = vmatmul.mubr.msk.f32.gmra.mrb[24].mxu1 %vm727_vm1, %v4988_v9  ;;  %4225 = vmatmul.mubr.msk.f32.gmra.mrb[26].mxu0 %vm727_vm1, %v633_v40  ;;  %v6592_v9 = vld [vmem:[#allocation11_spill] sm:$0xff]  ;;  %v6622_v40 = vrot.slane %v6621_v19, 1  ;;  %v712_v19 = vrot.slane %v204_v59, 1 }
  0xb9   :  { %4028 = vmatprep.mubr.msk.f32.mxu1 %vm727_vm1, %v6587_v42  ;;  %4227 = vmatprep.mubr.msk.f32.mxu0 %vm727_vm1, %v6588_v8  ;;  %v638_v31 = vsel %vm307_vm2, %v6590_v39, %v637_v57  ;;  %v186_v42 = vld [vmem:[%s6417_s1 + $0x238] sm:$0x1]  ;;  %v6625_v39 = vld [vmem:[#allocation48_spill] sm:$0xff] }
  0xba   :  { %v673_v57 = vsel %vm307_vm2, %v6622_v40, %v672_v26  ;;  %v6623_v8 = vld [vmem:[#allocation31_spill] sm:$0xff]  ;;  %v6654_v26 = vld [vmem:[#allocation58_spill] sm:$0xff]  ;;  %v207_v40 = vld [vmem:[%s6417_s1 + $0x2e0] sm:$0x1] }
  0xbc   :  { %4029 = vmatmul.mubr.msk.f32.gmra.mrb[26].mxu1 %vm727_vm1, %v6591_v33  ;;  %4228 = vmatmul.mubr.msk.f32.gmra.mrb[28].mxu0 %vm727_vm1, %v638_v31  ;;  %v6626_v31 = vld [vmem:[#allocation41_spill] sm:$0xff]  ;;  %v682_v33 = vrot.slane %v186_v42, 1  ;;  %v6660_v42 = vld [vmem:[#allocation75_spill] sm:$0xff] }
  0xbd   :  { %4031 = vmatprep.mubr.msk.f32.mxu1 %vm727_vm1, %v6592_v9  ;;  %4230 = vmatprep.mubr.msk.f32.mxu0 %vm727_vm1, %v6593_v3  ;;  %v6627_v37 = vrot.slane %v6626_v31, 1  ;;  %v189_v9 = vld [vmem:[%s6417_s1 + $0x250] sm:$0x1]  ;;  %v6628_v3 = vld [vmem:[#allocation35_spill] sm:$0xff]  ;;  %v717_v31 = vrot.slane %v207_v40, 1 }
  0xbf   :  { %v678_v53 = vsel %vm307_vm2, %v6627_v37, %v677_v58  ;;  %v6659_v58 = vld [vmem:[#allocation62_spill] sm:$0xff]  ;;  %v210_v37 = vld [vmem:[%s6417_s1 + $0x2f8] sm:$0x1] }
  0xc0   :  { %4032 = vmatmul.mubr.msk.f32.gmra.mrb[28].mxu1 %vm727_vm1, %v6596_v20  ;;  %4231 = vmatmul.mubr.msk.f32.gmra.mrb[30].mxu0 %vm727_vm1, %v643_v1  ;;  %v6631_v1 = vld [vmem:[#allocation45_spill] sm:$0xff]  ;;  %v687_v20 = vrot.slane %v189_v9, 1  ;;  %v6665_v9 = vrot.slane %v5667_v25, 1 }
  0xc1   :  { %4034 = vmatprep.mubr.msk.f32.mxu1 %vm727_vm1, %v6597_v63  ;;  %4233 = vmatprep.mubr.msk.f32.mxu0 %vm727_vm1, %v6598_v4  ;;  %v6632_v61 = vrot.slane %v6631_v1, 1  ;;  %v192_v63 = vld [vmem:[%s6417_s1 + $0x268] sm:$0x1]  ;;  %v6633_v4 = vld [vmem:[#allocation39_spill] sm:$0xff]  ;;  %v6667_v1 = vld [vmem:[#allocation70_spill] sm:$0xff] }
  0xc2   :  { %v6669_v25 = vld [vmem:[#allocation73_spill] sm:$0xff] }
  0xc3   :  { %v683_v38 = vsel %vm307_vm2, %v6632_v61, %v682_v33  ;;  %v6664_v33 = vld [vmem:[#allocation66_spill] sm:$0xff]  ;;  %v6668_v61 = vld [vmem:[#allocation71_spill] sm:$0xff] }
  0xc4   :  { %4035 = vmatmul.mubr.msk.f32.gmra.mrb[30].mxu1 %vm727_vm1, %v6601_v2  ;;  %4234 = vmatmul.mubr.msk.f32.gmra.mrb[32].mxu0 %vm727_vm1, %v648_v55  ;;  %v6636_v55 = vld [vmem:[#allocation49_spill] sm:$0xff]  ;;  %v692_v2 = vrot.slane %v192_v63, 1 }
  0xc5   :  { %4037 = vmatprep.mubr.msk.f32.mxu1 %vm727_vm1, %v6602_v41  ;;  %4236 = vmatprep.mubr.msk.f32.mxu0 %vm727_vm1, %v5285_v49  ;;  %v6606_v49 = vld [vmem:[#allocation28_spill] sm:$0xff]  ;;  %v6637_v35 = vrot.slane %v6636_v55, 1 }
  0xc6   :  { %v6607_v7 = vrot.slane %v6606_v49, 1  ;;  %v195_v41 = vld [vmem:[%s6417_s1 + $0x280] sm:$0x1] }
  0xc7   :  { %v688_v14 = vsel %vm307_vm2, %v6637_v35, %v687_v20  ;;  %v697_v49 = vrot.slane %v195_v41, 1 }
  0xc8   :  { %4038 = vmatmul.mubr.msk.f32.gmra.mrb[32].mxu1 %vm727_vm1, %v6604_v24  ;;  %4237 = vmatmul.mubr.msk.f32.gmra.mrb[34].mxu0 %vm727_vm1, %v653_v36  ;;  %v658_v5 = vsel %vm307_vm2, %v6607_v7, %v657_v30  ;;  %v6639_v36 = vld [vmem:[#allocation46_spill] sm:$0xff]  ;;  %v6640_v30 = vld [vmem:[#allocation60_spill] sm:$0xff]  ;;  %v6642_v24 = vrot.slane %v6641_v51, 1  ;;  %v198_v7 = vld [vmem:[%s6417_s1 + $0x298] sm:$0x1] }
  0xc9   :  { %4040 = vmatprep.mubr.msk.f32.mxu1 %vm727_vm1, %v6605_v17  ;;  %4239 = vmatprep.mubr.msk.f32.mxu0 %vm727_vm1, %v5293_v52  ;;  %v6611_v52 = vld [vmem:[#allocation29_spill] sm:$0xff] }
  0xca   :  { %v6612_v62 = vrot.slane %v6611_v52, 1  ;;  %v693_v17 = vsel %vm307_vm2, %v6642_v24, %v692_v2  ;;  %v702_v52 = vrot.slane %v198_v7, 1 }
  0xcc   :  { %4041 = vmatmul.mubr.msk.f32.gmra.mrb[34].mxu1 %vm727_vm1, %v6608_v6  ;;  %4240 = vmatmul.mubr.msk.f32.gmra.mrb[36].mxu0 %vm727_vm1, %v658_v5  ;;  %v663_v29 = vsel %vm307_vm2, %v6612_v62, %v662_v11  ;;  %v6643_v5 = vld [vmem:[#allocation47_spill] sm:$0xff]  ;;  %v6644_v11 = vld [vmem:[#allocation50_spill] sm:$0xff]  ;;  %v6646_v6 = vld [vmem:[#allocation57_spill] sm:$0xff] }
  0xcd   :  { %4043 = vmatprep.mubr.msk.f32.mxu1 %vm727_vm1, %v6609_v54  ;;  %4242 = vmatprep.mubr.msk.f32.mxu0 %vm727_vm1, %v6610_v27  ;;  %v6647_v54 = vrot.slane %v6646_v6, 1  ;;  %v201_v62 = vld [vmem:[%s6417_s1 + $0x2b0] sm:$0x1]  ;;  %s4561_s1 = smov [#allocation2]  }
  0xce   :  { %v707_v44 = vrot.slane %v201_v62, 1  ;;  %s3328_s18 = sshll.u32 %s4561_s1, 4  ;;  %s6354_s18 = int_to_ptr.vmem [resolvable:$true] %s3328_s18 }
  0xcf   :  { %v698_v27 = vsel %vm307_vm2, %v6647_v54, %v697_v49  ;;  %s4491_s19 = scalar_lea.vmem %s6354_s18, 8192  ;;  %p4496_p1 = scmp.lt.s32.totalorder %s6354_s18, %s6354_s18 }
  0xd0   :  { %4044 = vmatmul.mubr.msk.f32.gmra.mrb[36].mxu1 %vm727_vm1, %v6613_v43  ;;  %4243 = vmatmul.mubr.msk.f32.gmra.mrb[38].mxu0 %vm727_vm1, %v663_v29  ;;  %v6648_v29 = vld [vmem:[#allocation51_spill] sm:$0xff]  ;;  %v6651_v43 = vld [vmem:[#allocation61_spill] sm:$0xff]  ;;  %p4492_p0 = scmp.ne.s32.totalorder %s6354_s18, %s4491_s19  ;;  %p4497_p2 = scmp.lt.s32.totalorder %s4491_s19, %s4491_s19 }
  0xd1   :  { %4046 = vmatprep.mubr.msk.f32.mxu1 %vm727_vm1, %v6614_v23  ;;  %4245 = vmatprep.mubr.msk.f32.mxu0 %vm727_vm1, %v6615_v56  ;;  %v6652_v23 = vrot.slane %v6651_v43, 1 }
  0xd2   :  { %p4498_p3 = por %p4497_p2, %p4496_p1 }
  0xd3   :  { %v703_v56 = vsel %vm307_vm2, %v6652_v23, %v702_v52 }
  0xd4   :  { %4047 = vmatmul.mubr.msk.f32.gmra.mrb[38].mxu1 %vm727_vm1, %v6618_v16  ;;  %4246 = vmatmul.mubr.msk.f32.gmra.mrb[40].mxu0 %vm727_vm1, %v668_v47  ;;  %v6653_v47 = vld [vmem:[#allocation55_spill] sm:$0xff]  ;;  %v6656_v16 = vld [vmem:[#allocation65_spill] sm:$0xff]  ;;  %p4499_p4 = pnand %p4498_p3, %p4492_p0 }
  0xd5   :  { %4049 = vmatprep.mubr.msk.f32.mxu1 %vm727_vm1, %v6619_v12  ;;  %4248 = vmatprep.mubr.msk.f32.mxu0 %vm727_vm1, %v6620_v13  ;;  %v6657_v12 = vrot.slane %v6656_v16, 1 }
  0xd7   :  { %v708_v13 = vsel %vm307_vm2, %v6657_v12, %v707_v44 }
  0xd8   :  { %4050 = vmatmul.mubr.msk.f32.gmra.mrb[40].mxu1 %vm727_vm1, %v6623_v8  ;;  %4249 = vmatmul.mubr.msk.f32.gmra.mrb[42].mxu0 %vm727_vm1, %v673_v57  ;;  %v6658_v57 = vld [vmem:[#allocation59_spill] sm:$0xff]  ;;  %v6661_v8 = vld [vmem:[#allocation69_spill] sm:$0xff] }
  0xd9   :  { %4052 = vmatprep.mubr.msk.f32.mxu1 %vm727_vm1, %v6624_v21  ;;  %4251 = vmatprep.mubr.msk.f32.mxu0 %vm727_vm1, %v6625_v39  ;;  %v6662_v21 = vrot.slane %v6661_v8, 1 }
  0xdb   :  { %v713_v39 = vsel %vm307_vm2, %v6662_v21, %v712_v19 }
  0xdc   :  { %4053 = vmatmul.mubr.msk.f32.gmra.mrb[42].mxu1 %vm727_vm1, %v6628_v3  ;;  %4252 = vmatmul.mubr.msk.f32.gmra.mrb[44].mxu0 %vm727_vm1, %v678_v53  ;;  %v6663_v53 = vld [vmem:[#allocation63_spill] sm:$0xff]  ;;  %v718_v3 = vsel %vm307_vm2, %v6665_v9, %v717_v31 }
  0xdd   :  { %4055 = vmatprep.mubr.msk.f32.mxu1 %vm727_vm1, %v6629_v50  ;;  %4254 = vmatprep.mubr.msk.f32.mxu0 %vm727_vm1, %v6630_v48  ;;  %v722_v50 = vrot.slane %v210_v37, 1  ;;  %v6666_v48 = vld [vmem:[#allocation67_spill] sm:$0xff] }
  0xe0   :  { %4056 = vmatmul.mubr.msk.f32.gmra.mrb[44].mxu1 %vm727_vm1, %v6633_v4  ;;  %4255 = vmatmul.mubr.msk.f32.gmra.mrb[46].mxu0 %vm727_vm1, %v683_v38  ;;  %v6670_v38 = vld [vmem:[#allocation74_spill] sm:$0xff] }
  0xe1   :  { %4058 = vmatprep.mubr.msk.f32.mxu1 %vm727_vm1, %v6634_v22  ;;  %4257 = vmatprep.mubr.msk.f32.mxu0 %vm727_vm1, %v6635_v0 }
  0xe4   :  { %4059 = vmatmul.mubr.msk.f32.gmra.mrb[46].mxu1 %vm727_vm1, %v6638_v15  ;;  %4258 = vmatmul.mubr.msk.f32.gmra.mrb[48].mxu0 %vm727_vm1, %v688_v14 }
  0xe5   :  { %4061 = vmatprep.mubr.msk.f32.mxu1 %vm727_vm1, %v6639_v36  ;;  %4260 = vmatprep.mubr.msk.f32.mxu0 %vm727_vm1, %v6640_v30 }
  0xe8   :  { %4062 = vmatmul.mubr.msk.f32.gmra.mrb[48].mxu1 %vm727_vm1, %v6643_v5  ;;  %4261 = vmatmul.mubr.msk.f32.gmra.mrb[50].mxu0 %vm727_vm1, %v693_v17 }
  0xe9   :  { %4064 = vmatprep.mubr.msk.f32.mxu1 %vm727_vm1, %v6644_v11  ;;  %4263 = vmatprep.mubr.msk.f32.mxu0 %vm727_vm1, %v6645_v46 }
  0xec   :  { %4065 = vmatmul.mubr.msk.f32.gmra.mrb[50].mxu1 %vm727_vm1, %v6648_v29  ;;  %4264 = vmatmul.mubr.msk.f32.gmra.mrb[52].mxu0 %vm727_vm1, %v698_v27 }
  0xed   :  { %4067 = vmatprep.mubr.msk.f32.mxu1 %vm727_vm1, %v6649_v34  ;;  %4266 = vmatprep.mubr.msk.f32.mxu0 %vm727_vm1, %v6650_v28 }
  0xf0   :  { %4068 = vmatmul.mubr.msk.f32.gmra.mrb[52].mxu1 %vm727_vm1, %v6653_v47  ;;  %4267 = vmatmul.mubr.msk.f32.gmra.mrb[54].mxu0 %vm727_vm1, %v703_v56 }
  0xf1   :  { %4070 = vmatprep.mubr.msk.f32.mxu1 %vm727_vm1, %v6654_v26  ;;  %4269 = vmatprep.mubr.msk.f32.mxu0 %vm727_vm1, %v6655_v60 }
  0xf4   :  { %4071 = vmatmul.mubr.msk.f32.gmra.mrb[54].mxu1 %vm727_vm1, %v6658_v57  ;;  %4270 = vmatmul.mubr.msk.f32.gmra.mrb[56].mxu0 %vm727_vm1, %v708_v13 }
  0xf5   :  { %4073 = vmatprep.mubr.msk.f32.mxu1 %vm727_vm1, %v6659_v58  ;;  %4272 = vmatprep.mubr.msk.f32.mxu0 %vm727_vm1, %v6660_v42 }
  0xf8   :  { %4074 = vmatmul.mubr.msk.f32.gmra.mrb[56].mxu1 %vm727_vm1, %v6663_v53  ;;  %4273 = vmatmul.mubr.msk.f32.gmra.mrb[58].mxu0 %vm727_vm1, %v713_v39 }
  0xf9   :  { %4076 = vmatprep.mubr.msk.f32.mxu1 %vm727_vm1, %v6664_v33  ;;  %4275 = vmatprep.mubr.msk.f32.mxu0 %vm727_vm1, %v5715_v18  ;;  %v723_v18 = vsel %vm307_vm2, %v720_v45, %v722_v50 }
  0xfc   :  { %4077 = vmatmul.mubr.msk.f32.gmra.mrb[58].mxu1 %vm727_vm1, %v6666_v48  ;;  %4276 = vmatmul.mubr.msk.f32.gmra.mrb[60].mxu0 %vm727_vm1, %v718_v3 }
  0xfd   :  { %4079 = vmatprep.mubr.msk.f32.mxu1 %vm727_vm1, %v6667_v1  ;;  %4278 = vmatprep.mubr.msk.f32.mxu0 %vm727_vm1, %v5730_v32 }
 0x100   :  { %4080 = vmatmul.mubr.msk.f32.gmra.mrb[60].mxu1 %vm727_vm1, %v6668_v61  ;;  %4279 = vmatmul.mubr.msk.f32.gmra.mrb[62].mxu0 %vm727_vm1, %v723_v18 }
 0x101   :  { %4082 = vmatprep.mubr.msk.f32.mxu1 %vm727_vm1, %v6669_v25 }
 0x104   :  { %4083 = vmatmul.mubr.msk.f32.gmra.mrb[62].mxu1 %vm727_vm1, %v6670_v38 }
 0x157   :  { %v4187_v20 = vpop.f32.mrb[0].mxu0 }
 0x158   :  { %v2542_v63 = vpop.f32.mrb[1].mxu0 }
 0x15b   :  { %v3991_v4 = vpop.f32.mrb[0].mxu1  ;;  %v4190_v32 = vpop.f32.mrb[2].mxu0 }
 0x15c   :  { %v4281_v22 = vadd.f32 %v4187_v20, %v3991_v4  ;;  %v1442_v10 = vpop.f32.mrb[1].mxu1  ;;  %v2552_v0 = vpop.f32.mrb[3].mxu0 }
 0x15d   :  { %v4282_v45 = vadd.f32 %v2542_v63, %v1442_v10 }
 0x15e   :  { %2927 = vst.msk [vmem:[#allocation2 + $0x8] sm:$0xff] %vm2925_vm3, %v4281_v22  ;;  %v2991_v55 = vsel %vm2925_vm3, %v4281_v22, 0.0  ;;  %v3126_v35 = vmul.f32 %v4281_v22, %v4281_v22 }
 0x15f   :  { %2926 = vst.msk [vmem:[#allocation2] sm:$0xff] %vm2925_vm3, %v4282_v45  ;;  %v2990_v14 = vsel %vm2925_vm3, %v4282_v45, 0.0  ;;  %v3125_v2 = vmul.f32 %v4282_v45, %v4282_v45  ;;  %v3994_v41 = vpop.f32.mrb[2].mxu1  ;;  %v4193_v15 = vpop.f32.mrb[4].mxu0 }
 0x160   :  { %v3190_v36 = vsel %vm2925_vm3, %v3126_v35, 0.0  ;;  %v2992_v30 = vadd.f32 %v2991_v55, %v2990_v14  ;;  %v4283_v51 = vadd.f32 %v4190_v32, %v3994_v41  ;;  %v1452_v24 = vpop.f32.mrb[3].mxu1  ;;  %v2562_v17 = vpop.f32.mrb[5].mxu0 }
 0x161   :  { %v3189_v49 = vsel %vm2925_vm3, %v3125_v2, 0.0  ;;  %v4284_v7 = vadd.f32 %v2552_v0, %v1452_v24 }
 0x162   :  { %v3191_v5 = vadd.f32 %v3190_v36, %v3189_v49  ;;  %2929 = vst.msk [vmem:[#allocation2 + $0x18] sm:$0xff] %vm2925_vm3, %v4283_v51  ;;  %v3128_v11 = vmul.f32 %v4283_v51, %v4283_v51  ;;  %v2995_v28 = vsel %vm2925_vm3, %v4283_v51, 0.0 }
 0x163   :  { %2928 = vst.msk [vmem:[#allocation2 + $0x10] sm:$0xff] %vm2925_vm3, %v4284_v7  ;;  %v2993_v46 = vsel %vm2925_vm3, %v4284_v7, 0.0  ;;  %v3127_v6 = vmul.f32 %v4284_v7, %v4284_v7  ;;  %v3997_v54 = vpop.f32.mrb[4].mxu1  ;;  %v4196_v27 = vpop.f32.mrb[6].mxu0 }
 0x164   :  { %v2994_v52 = vadd.f32 %v2993_v46, %v2992_v30  ;;  %v4285_v62 = vadd.f32 %v4193_v15, %v3997_v54  ;;  %v1462_v29 = vpop.f32.mrb[5].mxu1  ;;  %v2572_v34 = vpop.f32.mrb[7].mxu0  ;;  %v3194_v59 = vsel %vm2925_vm3, %v3128_v11, 0.0 }
 0x165   :  { %v3192_v43 = vsel %vm2925_vm3, %v3127_v6, 0.0  ;;  %v4286_v23 = vadd.f32 %v2562_v17, %v1462_v29 }
 0x166   :  { %v2996_v56 = vadd.f32 %v2995_v28, %v2994_v52  ;;  %v3193_v44 = vadd.f32 %v3192_v43, %v3191_v5  ;;  %2931 = vst.msk [vmem:[#allocation2 + $0x28] sm:$0xff] %vm2925_vm3, %v4285_v62  ;;  %v3130_v47 = vmul.f32 %v4285_v62, %v4285_v62  ;;  %v2999_v42 = vsel %vm2925_vm3, %v4285_v62, 0.0 }
 0x167   :  { %2930 = vst.msk [vmem:[#allocation2 + $0x20] sm:$0xff] %vm2925_vm3, %v4286_v23  ;;  %v2997_v26 = vsel %vm2925_vm3, %v4286_v23, 0.0  ;;  %v3129_v60 = vmul.f32 %v4286_v23, %v4286_v23  ;;  %v4000_v16 = vpop.f32.mrb[6].mxu1  ;;  %v4199_v12 = vpop.f32.mrb[8].mxu0 }
 0x168   :  { %v3195_v13 = vadd.f32 %v3194_v59, %v3193_v44  ;;  %v2998_v19 = vadd.f32 %v2997_v26, %v2996_v56  ;;  %v4287_v40 = vadd.f32 %v4196_v27, %v4000_v16  ;;  %v1472_v57 = vpop.f32.mrb[7].mxu1  ;;  %v2582_v58 = vpop.f32.mrb[9].mxu0  ;;  %v3198_v37 = vsel %vm2925_vm3, %v3130_v47, 0.0 }
 0x169   :  { %v3196_v8 = vsel %vm2925_vm3, %v3129_v60, 0.0  ;;  %v4288_v21 = vadd.f32 %v2572_v34, %v1472_v57 }
 0x16a   :  { %v3197_v39 = vadd.f32 %v3196_v8, %v3195_v13  ;;  %2933 = vst.msk [vmem:[#allocation2 + $0x38] sm:$0xff] %vm2925_vm3, %v4287_v40  ;;  %v3000_v31 = vadd.f32 %v2999_v42, %v2998_v19  ;;  %v3132_v53 = vmul.f32 %v4287_v40, %v4287_v40  ;;  %v3003_v38 = vsel %vm2925_vm3, %v4287_v40, 0.0 }
 0x16b   :  { %2932 = vst.msk [vmem:[#allocation2 + $0x30] sm:$0xff] %vm2925_vm3, %v4288_v21  ;;  %v3001_v33 = vsel %vm2925_vm3, %v4288_v21, 0.0  ;;  %v3131_v9 = vmul.f32 %v4288_v21, %v4288_v21  ;;  %v4003_v3 = vpop.f32.mrb[8].mxu1  ;;  %v4202_v50 = vpop.f32.mrb[10].mxu0 }
 0x16c   :  { %v3002_v48 = vadd.f32 %v3001_v33, %v3000_v31  ;;  %v3199_v1 = vadd.f32 %v3198_v37, %v3197_v39  ;;  %v4289_v18 = vadd.f32 %v4199_v12, %v4003_v3  ;;  %v1482_v61 = vpop.f32.mrb[9].mxu1  ;;  %v2592_v25 = vpop.f32.mrb[11].mxu0  ;;  %v3202_v22 = vsel %vm2925_vm3, %v3132_v53, 0.0 }
 0x16d   :  { %v3200_v20 = vsel %vm2925_vm3, %v3131_v9, 0.0  ;;  %v4290_v63 = vadd.f32 %v2582_v58, %v1482_v61 }
 0x16e   :  { %v3201_v4 = vadd.f32 %v3200_v20, %v3199_v1  ;;  %2935 = vst.msk [vmem:[#allocation2 + $0x48] sm:$0xff] %vm2925_vm3, %v4289_v18  ;;  %v3004_v32 = vadd.f32 %v3003_v38, %v3002_v48  ;;  %v3134_v10 = vmul.f32 %v4289_v18, %v4289_v18  ;;  %v3007_v30 = vsel %vm2925_vm3, %v4289_v18, 0.0 }
 0x16f   :  { %2934 = vst.msk [vmem:[#allocation2 + $0x40] sm:$0xff] %vm2925_vm3, %v4290_v63  ;;  %v3005_v0 = vsel %vm2925_vm3, %v4290_v63, 0.0  ;;  %v3133_v45 = vmul.f32 %v4290_v63, %v4290_v63  ;;  %v4006_v55 = vpop.f32.mrb[10].mxu1  ;;  %v4205_v35 = vpop.f32.mrb[12].mxu0 }
 0x170   :  { %v3006_v14 = vadd.f32 %v3005_v0, %v3004_v32  ;;  %v3203_v2 = vadd.f32 %v3202_v22, %v3201_v4  ;;  %v4291_v41 = vadd.f32 %v4202_v50, %v4006_v55  ;;  %v1492_v15 = vpop.f32.mrb[11].mxu1  ;;  %v2602_v36 = vpop.f32.mrb[13].mxu0  ;;  %v3206_v7 = vsel %vm2925_vm3, %v3134_v10, 0.0 }
 0x171   :  { %v3204_v51 = vsel %vm2925_vm3, %v3133_v45, 0.0  ;;  %v4292_v24 = vadd.f32 %v2592_v25, %v1492_v15 }
 0x172   :  { %v3205_v17 = vadd.f32 %v3204_v51, %v3203_v2  ;;  %2937 = vst.msk [vmem:[#allocation2 + $0x58] sm:$0xff] %vm2925_vm3, %v4291_v41  ;;  %v3008_v49 = vadd.f32 %v3007_v30, %v3006_v14  ;;  %v3136_v5 = vmul.f32 %v4291_v41, %v4291_v41  ;;  %v3011_v28 = vsel %vm2925_vm3, %v4291_v41, 0.0 }
 0x173   :  { %2936 = vst.msk [vmem:[#allocation2 + $0x50] sm:$0xff] %vm2925_vm3, %v4292_v24  ;;  %v3009_v11 = vsel %vm2925_vm3, %v4292_v24, 0.0  ;;  %v3135_v46 = vmul.f32 %v4292_v24, %v4292_v24  ;;  %v4009_v6 = vpop.f32.mrb[12].mxu1  ;;  %v4208_v54 = vpop.f32.mrb[14].mxu0 }
 0x174   :  { %v3010_v27 = vadd.f32 %v3009_v11, %v3008_v49  ;;  %v3207_v52 = vadd.f32 %v3206_v7, %v3205_v17  ;;  %v4293_v62 = vadd.f32 %v4205_v35, %v4009_v6  ;;  %v1502_v29 = vpop.f32.mrb[13].mxu1  ;;  %v2612_v34 = vpop.f32.mrb[15].mxu0  ;;  %v3210_v59 = vsel %vm2925_vm3, %v3136_v5, 0.0 }
 0x175   :  { %v3208_v43 = vsel %vm2925_vm3, %v3135_v46, 0.0  ;;  %v4294_v23 = vadd.f32 %v2602_v36, %v1502_v29 }
 0x176   :  { %v3209_v56 = vadd.f32 %v3208_v43, %v3207_v52  ;;  %2939 = vst.msk [vmem:[#allocation2 + $0x68] sm:$0xff] %vm2925_vm3, %v4293_v62  ;;  %v3012_v44 = vadd.f32 %v3011_v28, %v3010_v27  ;;  %v3138_v47 = vmul.f32 %v4293_v62, %v4293_v62  ;;  %v3015_v42 = vsel %vm2925_vm3, %v4293_v62, 0.0 }
 0x177   :  { %2938 = vst.msk [vmem:[#allocation2 + $0x60] sm:$0xff] %vm2925_vm3, %v4294_v23  ;;  %v3013_v26 = vsel %vm2925_vm3, %v4294_v23, 0.0  ;;  %v3137_v60 = vmul.f32 %v4294_v23, %v4294_v23  ;;  %v4012_v16 = vpop.f32.mrb[14].mxu1  ;;  %v4211_v12 = vpop.f32.mrb[16].mxu0 }
 0x178   :  { %v3014_v13 = vadd.f32 %v3013_v26, %v3012_v44  ;;  %v3211_v19 = vadd.f32 %v3210_v59, %v3209_v56  ;;  %v4295_v40 = vadd.f32 %v4208_v54, %v4012_v16  ;;  %v1512_v57 = vpop.f32.mrb[15].mxu1  ;;  %v2622_v58 = vpop.f32.mrb[17].mxu0  ;;  %v3214_v37 = vsel %vm2925_vm3, %v3138_v47, 0.0 }
 0x179   :  { %v3212_v8 = vsel %vm2925_vm3, %v3137_v60, 0.0  ;;  %v4296_v21 = vadd.f32 %v2612_v34, %v1512_v57 }
 0x17a   :  { %v3213_v39 = vadd.f32 %v3212_v8, %v3211_v19  ;;  %2941 = vst.msk [vmem:[#allocation2 + $0x78] sm:$0xff] %vm2925_vm3, %v4295_v40  ;;  %v3016_v31 = vadd.f32 %v3015_v42, %v3014_v13  ;;  %v3140_v53 = vmul.f32 %v4295_v40, %v4295_v40  ;;  %v3019_v38 = vsel %vm2925_vm3, %v4295_v40, 0.0 }
 0x17b   :  { %2940 = vst.msk [vmem:[#allocation2 + $0x70] sm:$0xff] %vm2925_vm3, %v4296_v21  ;;  %v3017_v33 = vsel %vm2925_vm3, %v4296_v21, 0.0  ;;  %v3139_v9 = vmul.f32 %v4296_v21, %v4296_v21  ;;  %v4015_v3 = vpop.f32.mrb[16].mxu1  ;;  %v4214_v50 = vpop.f32.mrb[18].mxu0 }
 0x17c   :  { %v3018_v48 = vadd.f32 %v3017_v33, %v3016_v31  ;;  %v3215_v1 = vadd.f32 %v3214_v37, %v3213_v39  ;;  %v4297_v18 = vadd.f32 %v4211_v12, %v4015_v3  ;;  %v1522_v61 = vpop.f32.mrb[17].mxu1  ;;  %v2632_v25 = vpop.f32.mrb[19].mxu0  ;;  %v3218_v22 = vsel %vm2925_vm3, %v3140_v53, 0.0 }
 0x17d   :  { %v3216_v20 = vsel %vm2925_vm3, %v3139_v9, 0.0  ;;  %v4298_v63 = vadd.f32 %v2622_v58, %v1522_v61 }
 0x17e   :  { %v3217_v4 = vadd.f32 %v3216_v20, %v3215_v1  ;;  %2943 = vst.msk [vmem:[#allocation2 + $0x88] sm:$0xff] %vm2925_vm3, %v4297_v18  ;;  %v3020_v32 = vadd.f32 %v3019_v38, %v3018_v48  ;;  %v3142_v10 = vmul.f32 %v4297_v18, %v4297_v18  ;;  %v3023_v30 = vsel %vm2925_vm3, %v4297_v18, 0.0 }
 0x17f   :  { %2942 = vst.msk [vmem:[#allocation2 + $0x80] sm:$0xff] %vm2925_vm3, %v4298_v63  ;;  %v3021_v0 = vsel %vm2925_vm3, %v4298_v63, 0.0  ;;  %v3141_v45 = vmul.f32 %v4298_v63, %v4298_v63  ;;  %v4018_v55 = vpop.f32.mrb[18].mxu1  ;;  %v4217_v35 = vpop.f32.mrb[20].mxu0 }
 0x180   :  { %v3022_v14 = vadd.f32 %v3021_v0, %v3020_v32  ;;  %v3219_v2 = vadd.f32 %v3218_v22, %v3217_v4  ;;  %v4299_v41 = vadd.f32 %v4214_v50, %v4018_v55  ;;  %v1532_v15 = vpop.f32.mrb[19].mxu1  ;;  %v2642_v36 = vpop.f32.mrb[21].mxu0  ;;  %v3222_v7 = vsel %vm2925_vm3, %v3142_v10, 0.0 }
 0x181   :  { %v3220_v51 = vsel %vm2925_vm3, %v3141_v45, 0.0  ;;  %v4300_v24 = vadd.f32 %v2632_v25, %v1532_v15 }
 0x182   :  { %v3221_v17 = vadd.f32 %v3220_v51, %v3219_v2  ;;  %2945 = vst.msk [vmem:[#allocation2 + $0x98] sm:$0xff] %vm2925_vm3, %v4299_v41  ;;  %v3024_v49 = vadd.f32 %v3023_v30, %v3022_v14  ;;  %v3144_v5 = vmul.f32 %v4299_v41, %v4299_v41  ;;  %v3027_v28 = vsel %vm2925_vm3, %v4299_v41, 0.0 }
 0x183   :  { %2944 = vst.msk [vmem:[#allocation2 + $0x90] sm:$0xff] %vm2925_vm3, %v4300_v24  ;;  %v3025_v11 = vsel %vm2925_vm3, %v4300_v24, 0.0  ;;  %v3143_v46 = vmul.f32 %v4300_v24, %v4300_v24  ;;  %v4021_v6 = vpop.f32.mrb[20].mxu1  ;;  %v4220_v54 = vpop.f32.mrb[22].mxu0 }
 0x184   :  { %v3026_v27 = vadd.f32 %v3025_v11, %v3024_v49  ;;  %v3223_v52 = vadd.f32 %v3222_v7, %v3221_v17  ;;  %v4301_v62 = vadd.f32 %v4217_v35, %v4021_v6  ;;  %v1542_v29 = vpop.f32.mrb[21].mxu1  ;;  %v2652_v34 = vpop.f32.mrb[23].mxu0  ;;  %v3226_v59 = vsel %vm2925_vm3, %v3144_v5, 0.0 }
 0x185   :  { %v3224_v43 = vsel %vm2925_vm3, %v3143_v46, 0.0  ;;  %v4302_v23 = vadd.f32 %v2642_v36, %v1542_v29 }
 0x186   :  { %v3225_v56 = vadd.f32 %v3224_v43, %v3223_v52  ;;  %2947 = vst.msk [vmem:[#allocation2 + $0xa8] sm:$0xff] %vm2925_vm3, %v4301_v62  ;;  %v3028_v44 = vadd.f32 %v3027_v28, %v3026_v27  ;;  %v3146_v47 = vmul.f32 %v4301_v62, %v4301_v62  ;;  %v3031_v42 = vsel %vm2925_vm3, %v4301_v62, 0.0 }
 0x187   :  { %2946 = vst.msk [vmem:[#allocation2 + $0xa0] sm:$0xff] %vm2925_vm3, %v4302_v23  ;;  %v3029_v26 = vsel %vm2925_vm3, %v4302_v23, 0.0  ;;  %v3145_v60 = vmul.f32 %v4302_v23, %v4302_v23  ;;  %v4024_v16 = vpop.f32.mrb[22].mxu1  ;;  %v4223_v12 = vpop.f32.mrb[24].mxu0 }
 0x188   :  { %v3030_v13 = vadd.f32 %v3029_v26, %v3028_v44  ;;  %v3227_v19 = vadd.f32 %v3226_v59, %v3225_v56  ;;  %v4303_v40 = vadd.f32 %v4220_v54, %v4024_v16  ;;  %v1552_v57 = vpop.f32.mrb[23].mxu1  ;;  %v2662_v58 = vpop.f32.mrb[25].mxu0  ;;  %v3230_v37 = vsel %vm2925_vm3, %v3146_v47, 0.0 }
 0x189   :  { %v3228_v8 = vsel %vm2925_vm3, %v3145_v60, 0.0  ;;  %v4304_v21 = vadd.f32 %v2652_v34, %v1552_v57 }
 0x18a   :  { %v3229_v39 = vadd.f32 %v3228_v8, %v3227_v19  ;;  %2949 = vst.msk [vmem:[#allocation2 + $0xb8] sm:$0xff] %vm2925_vm3, %v4303_v40  ;;  %v3032_v31 = vadd.f32 %v3031_v42, %v3030_v13  ;;  %v3148_v53 = vmul.f32 %v4303_v40, %v4303_v40  ;;  %v3035_v38 = vsel %vm2925_vm3, %v4303_v40, 0.0 }
 0x18b   :  { %2948 = vst.msk [vmem:[#allocation2 + $0xb0] sm:$0xff] %vm2925_vm3, %v4304_v21  ;;  %v3033_v33 = vsel %vm2925_vm3, %v4304_v21, 0.0  ;;  %v3147_v9 = vmul.f32 %v4304_v21, %v4304_v21  ;;  %v4027_v3 = vpop.f32.mrb[24].mxu1  ;;  %v4226_v50 = vpop.f32.mrb[26].mxu0 }
 0x18c   :  { %v3034_v48 = vadd.f32 %v3033_v33, %v3032_v31  ;;  %v3231_v1 = vadd.f32 %v3230_v37, %v3229_v39  ;;  %v4305_v18 = vadd.f32 %v4223_v12, %v4027_v3  ;;  %v1562_v61 = vpop.f32.mrb[25].mxu1  ;;  %v2672_v25 = vpop.f32.mrb[27].mxu0  ;;  %v3234_v22 = vsel %vm2925_vm3, %v3148_v53, 0.0 }
 0x18d   :  { %v3232_v20 = vsel %vm2925_vm3, %v3147_v9, 0.0  ;;  %v4306_v63 = vadd.f32 %v2662_v58, %v1562_v61 }
 0x18e   :  { %v3233_v4 = vadd.f32 %v3232_v20, %v3231_v1  ;;  %2951 = vst.msk [vmem:[#allocation2 + $0xc8] sm:$0xff] %vm2925_vm3, %v4305_v18  ;;  %v3036_v32 = vadd.f32 %v3035_v38, %v3034_v48  ;;  %v3150_v10 = vmul.f32 %v4305_v18, %v4305_v18  ;;  %v3039_v30 = vsel %vm2925_vm3, %v4305_v18, 0.0 }
 0x18f   :  { %2950 = vst.msk [vmem:[#allocation2 + $0xc0] sm:$0xff] %vm2925_vm3, %v4306_v63  ;;  %v3037_v0 = vsel %vm2925_vm3, %v4306_v63, 0.0  ;;  %v3149_v45 = vmul.f32 %v4306_v63, %v4306_v63  ;;  %v4030_v55 = vpop.f32.mrb[26].mxu1  ;;  %v4229_v35 = vpop.f32.mrb[28].mxu0 }
 0x190   :  { %v3038_v14 = vadd.f32 %v3037_v0, %v3036_v32  ;;  %v3235_v2 = vadd.f32 %v3234_v22, %v3233_v4  ;;  %v4307_v41 = vadd.f32 %v4226_v50, %v4030_v55  ;;  %v1572_v15 = vpop.f32.mrb[27].mxu1  ;;  %v2682_v36 = vpop.f32.mrb[29].mxu0  ;;  %v3238_v7 = vsel %vm2925_vm3, %v3150_v10, 0.0 }
 0x191   :  { %v3236_v51 = vsel %vm2925_vm3, %v3149_v45, 0.0  ;;  %v4308_v24 = vadd.f32 %v2672_v25, %v1572_v15 }
 0x192   :  { %v3237_v17 = vadd.f32 %v3236_v51, %v3235_v2  ;;  %2953 = vst.msk [vmem:[#allocation2 + $0xd8] sm:$0xff] %vm2925_vm3, %v4307_v41  ;;  %v3040_v49 = vadd.f32 %v3039_v30, %v3038_v14  ;;  %v3152_v5 = vmul.f32 %v4307_v41, %v4307_v41  ;;  %v3043_v28 = vsel %vm2925_vm3, %v4307_v41, 0.0 }
 0x193   :  { %2952 = vst.msk [vmem:[#allocation2 + $0xd0] sm:$0xff] %vm2925_vm3, %v4308_v24  ;;  %v3041_v11 = vsel %vm2925_vm3, %v4308_v24, 0.0  ;;  %v3151_v46 = vmul.f32 %v4308_v24, %v4308_v24  ;;  %v4033_v6 = vpop.f32.mrb[28].mxu1  ;;  %v4232_v54 = vpop.f32.mrb[30].mxu0 }
 0x194   :  { %v3042_v27 = vadd.f32 %v3041_v11, %v3040_v49  ;;  %v3239_v52 = vadd.f32 %v3238_v7, %v3237_v17  ;;  %v4309_v62 = vadd.f32 %v4229_v35, %v4033_v6  ;;  %v1582_v29 = vpop.f32.mrb[29].mxu1  ;;  %v2692_v34 = vpop.f32.mrb[31].mxu0  ;;  %v3242_v59 = vsel %vm2925_vm3, %v3152_v5, 0.0 }
 0x195   :  { %v3240_v43 = vsel %vm2925_vm3, %v3151_v46, 0.0  ;;  %v4310_v23 = vadd.f32 %v2682_v36, %v1582_v29 }
 0x196   :  { %v3241_v56 = vadd.f32 %v3240_v43, %v3239_v52  ;;  %2955 = vst.msk [vmem:[#allocation2 + $0xe8] sm:$0xff] %vm2925_vm3, %v4309_v62  ;;  %v3044_v44 = vadd.f32 %v3043_v28, %v3042_v27  ;;  %v3154_v47 = vmul.f32 %v4309_v62, %v4309_v62  ;;  %v3047_v42 = vsel %vm2925_vm3, %v4309_v62, 0.0 }
 0x197   :  { %2954 = vst.msk [vmem:[#allocation2 + $0xe0] sm:$0xff] %vm2925_vm3, %v4310_v23  ;;  %v3045_v26 = vsel %vm2925_vm3, %v4310_v23, 0.0  ;;  %v3153_v60 = vmul.f32 %v4310_v23, %v4310_v23  ;;  %v4036_v16 = vpop.f32.mrb[30].mxu1  ;;  %v4235_v12 = vpop.f32.mrb[32].mxu0 }
 0x198   :  { %v3046_v13 = vadd.f32 %v3045_v26, %v3044_v44  ;;  %v3243_v19 = vadd.f32 %v3242_v59, %v3241_v56  ;;  %v4311_v40 = vadd.f32 %v4232_v54, %v4036_v16  ;;  %v1592_v57 = vpop.f32.mrb[31].mxu1  ;;  %v2702_v58 = vpop.f32.mrb[33].mxu0  ;;  %v3246_v37 = vsel %vm2925_vm3, %v3154_v47, 0.0 }
 0x199   :  { %v3244_v8 = vsel %vm2925_vm3, %v3153_v60, 0.0  ;;  %v4312_v21 = vadd.f32 %v2692_v34, %v1592_v57 }
 0x19a   :  { %v3245_v39 = vadd.f32 %v3244_v8, %v3243_v19  ;;  %2957 = vst.msk [vmem:[#allocation2 + $0xf8] sm:$0xff] %vm2925_vm3, %v4311_v40  ;;  %v3048_v31 = vadd.f32 %v3047_v42, %v3046_v13  ;;  %v3156_v53 = vmul.f32 %v4311_v40, %v4311_v40  ;;  %v3051_v38 = vsel %vm2925_vm3, %v4311_v40, 0.0 }
 0x19b   :  { %2956 = vst.msk [vmem:[#allocation2 + $0xf0] sm:$0xff] %vm2925_vm3, %v4312_v21  ;;  %v3049_v33 = vsel %vm2925_vm3, %v4312_v21, 0.0  ;;  %v3155_v9 = vmul.f32 %v4312_v21, %v4312_v21  ;;  %v4039_v3 = vpop.f32.mrb[32].mxu1  ;;  %v4238_v50 = vpop.f32.mrb[34].mxu0 }
 0x19c   :  { %v3050_v48 = vadd.f32 %v3049_v33, %v3048_v31  ;;  %v3247_v1 = vadd.f32 %v3246_v37, %v3245_v39  ;;  %v4313_v18 = vadd.f32 %v4235_v12, %v4039_v3  ;;  %v1602_v61 = vpop.f32.mrb[33].mxu1  ;;  %v2712_v25 = vpop.f32.mrb[35].mxu0  ;;  %v3250_v22 = vsel %vm2925_vm3, %v3156_v53, 0.0 }
 0x19d   :  { %v3248_v20 = vsel %vm2925_vm3, %v3155_v9, 0.0  ;;  %v4314_v63 = vadd.f32 %v2702_v58, %v1602_v61 }
 0x19e   :  { %v3249_v4 = vadd.f32 %v3248_v20, %v3247_v1  ;;  %2959 = vst.msk [vmem:[#allocation2 + $0x108] sm:$0xff] %vm2925_vm3, %v4313_v18  ;;  %v3052_v32 = vadd.f32 %v3051_v38, %v3050_v48  ;;  %v3158_v10 = vmul.f32 %v4313_v18, %v4313_v18  ;;  %v3055_v30 = vsel %vm2925_vm3, %v4313_v18, 0.0 }
 0x19f   :  { %2958 = vst.msk [vmem:[#allocation2 + $0x100] sm:$0xff] %vm2925_vm3, %v4314_v63  ;;  %v3053_v0 = vsel %vm2925_vm3, %v4314_v63, 0.0  ;;  %v3157_v45 = vmul.f32 %v4314_v63, %v4314_v63  ;;  %v4042_v55 = vpop.f32.mrb[34].mxu1  ;;  %v4241_v35 = vpop.f32.mrb[36].mxu0 }
 0x1a0   :  { %v3054_v14 = vadd.f32 %v3053_v0, %v3052_v32  ;;  %v3251_v2 = vadd.f32 %v3250_v22, %v3249_v4  ;;  %v4315_v41 = vadd.f32 %v4238_v50, %v4042_v55  ;;  %v1612_v15 = vpop.f32.mrb[35].mxu1  ;;  %v2722_v36 = vpop.f32.mrb[37].mxu0  ;;  %v3254_v7 = vsel %vm2925_vm3, %v3158_v10, 0.0 }
 0x1a1   :  { %v3252_v51 = vsel %vm2925_vm3, %v3157_v45, 0.0  ;;  %v4316_v24 = vadd.f32 %v2712_v25, %v1612_v15 }
 0x1a2   :  { %v3253_v17 = vadd.f32 %v3252_v51, %v3251_v2  ;;  %2961 = vst.msk [vmem:[#allocation2 + $0x118] sm:$0xff] %vm2925_vm3, %v4315_v41  ;;  %v3056_v49 = vadd.f32 %v3055_v30, %v3054_v14  ;;  %v3160_v5 = vmul.f32 %v4315_v41, %v4315_v41  ;;  %v3059_v28 = vsel %vm2925_vm3, %v4315_v41, 0.0 }
 0x1a3   :  { %2960 = vst.msk [vmem:[#allocation2 + $0x110] sm:$0xff] %vm2925_vm3, %v4316_v24  ;;  %v3057_v11 = vsel %vm2925_vm3, %v4316_v24, 0.0  ;;  %v3159_v46 = vmul.f32 %v4316_v24, %v4316_v24  ;;  %v4045_v6 = vpop.f32.mrb[36].mxu1  ;;  %v4244_v54 = vpop.f32.mrb[38].mxu0 }
 0x1a4   :  { %v3058_v27 = vadd.f32 %v3057_v11, %v3056_v49  ;;  %v3255_v52 = vadd.f32 %v3254_v7, %v3253_v17  ;;  %v4317_v62 = vadd.f32 %v4241_v35, %v4045_v6  ;;  %v1622_v29 = vpop.f32.mrb[37].mxu1  ;;  %v2732_v34 = vpop.f32.mrb[39].mxu0  ;;  %v3258_v59 = vsel %vm2925_vm3, %v3160_v5, 0.0 }
 0x1a5   :  { %v3256_v43 = vsel %vm2925_vm3, %v3159_v46, 0.0  ;;  %v4318_v23 = vadd.f32 %v2722_v36, %v1622_v29 }
 0x1a6   :  { %v3257_v56 = vadd.f32 %v3256_v43, %v3255_v52  ;;  %2963 = vst.msk [vmem:[#allocation2 + $0x128] sm:$0xff] %vm2925_vm3, %v4317_v62  ;;  %v3060_v44 = vadd.f32 %v3059_v28, %v3058_v27  ;;  %v3162_v47 = vmul.f32 %v4317_v62, %v4317_v62  ;;  %v3063_v42 = vsel %vm2925_vm3, %v4317_v62, 0.0 }
 0x1a7   :  { %2962 = vst.msk [vmem:[#allocation2 + $0x120] sm:$0xff] %vm2925_vm3, %v4318_v23  ;;  %v3061_v26 = vsel %vm2925_vm3, %v4318_v23, 0.0  ;;  %v3161_v60 = vmul.f32 %v4318_v23, %v4318_v23  ;;  %v4048_v16 = vpop.f32.mrb[38].mxu1  ;;  %v4247_v12 = vpop.f32.mrb[40].mxu0 }
 0x1a8   :  { %v3062_v13 = vadd.f32 %v3061_v26, %v3060_v44  ;;  %v3259_v19 = vadd.f32 %v3258_v59, %v3257_v56  ;;  %v4319_v40 = vadd.f32 %v4244_v54, %v4048_v16  ;;  %v1632_v57 = vpop.f32.mrb[39].mxu1  ;;  %v2742_v58 = vpop.f32.mrb[41].mxu0  ;;  %v3262_v37 = vsel %vm2925_vm3, %v3162_v47, 0.0 }
 0x1a9   :  { %v3260_v8 = vsel %vm2925_vm3, %v3161_v60, 0.0  ;;  %v4320_v21 = vadd.f32 %v2732_v34, %v1632_v57 }
 0x1aa   :  { %v3261_v39 = vadd.f32 %v3260_v8, %v3259_v19  ;;  %2965 = vst.msk [vmem:[#allocation2 + $0x138] sm:$0xff] %vm2925_vm3, %v4319_v40  ;;  %v3064_v31 = vadd.f32 %v3063_v42, %v3062_v13  ;;  %v3164_v53 = vmul.f32 %v4319_v40, %v4319_v40  ;;  %v3067_v38 = vsel %vm2925_vm3, %v4319_v40, 0.0 }
 0x1ab   :  { %2964 = vst.msk [vmem:[#allocation2 + $0x130] sm:$0xff] %vm2925_vm3, %v4320_v21  ;;  %v3065_v33 = vsel %vm2925_vm3, %v4320_v21, 0.0  ;;  %v3163_v9 = vmul.f32 %v4320_v21, %v4320_v21  ;;  %v4051_v3 = vpop.f32.mrb[40].mxu1  ;;  %v4250_v50 = vpop.f32.mrb[42].mxu0 }
 0x1ac   :  { %v3066_v48 = vadd.f32 %v3065_v33, %v3064_v31  ;;  %v3263_v1 = vadd.f32 %v3262_v37, %v3261_v39  ;;  %v4321_v18 = vadd.f32 %v4247_v12, %v4051_v3  ;;  %v1642_v61 = vpop.f32.mrb[41].mxu1  ;;  %v2752_v25 = vpop.f32.mrb[43].mxu0  ;;  %v3266_v22 = vsel %vm2925_vm3, %v3164_v53, 0.0 }
 0x1ad   :  { %v3264_v20 = vsel %vm2925_vm3, %v3163_v9, 0.0  ;;  %v4322_v63 = vadd.f32 %v2742_v58, %v1642_v61 }
 0x1ae   :  { %v3265_v4 = vadd.f32 %v3264_v20, %v3263_v1  ;;  %2967 = vst.msk [vmem:[#allocation2 + $0x148] sm:$0xff] %vm2925_vm3, %v4321_v18  ;;  %v3068_v32 = vadd.f32 %v3067_v38, %v3066_v48  ;;  %v3166_v10 = vmul.f32 %v4321_v18, %v4321_v18  ;;  %v3071_v30 = vsel %vm2925_vm3, %v4321_v18, 0.0 }
 0x1af   :  { %2966 = vst.msk [vmem:[#allocation2 + $0x140] sm:$0xff] %vm2925_vm3, %v4322_v63  ;;  %v3069_v0 = vsel %vm2925_vm3, %v4322_v63, 0.0  ;;  %v3165_v45 = vmul.f32 %v4322_v63, %v4322_v63  ;;  %v4054_v55 = vpop.f32.mrb[42].mxu1  ;;  %v4253_v35 = vpop.f32.mrb[44].mxu0 }
 0x1b0   :  { %v3070_v14 = vadd.f32 %v3069_v0, %v3068_v32  ;;  %v3267_v2 = vadd.f32 %v3266_v22, %v3265_v4  ;;  %v4323_v41 = vadd.f32 %v4250_v50, %v4054_v55  ;;  %v1652_v15 = vpop.f32.mrb[43].mxu1  ;;  %v2762_v36 = vpop.f32.mrb[45].mxu0  ;;  %v3270_v7 = vsel %vm2925_vm3, %v3166_v10, 0.0 }
 0x1b1   :  { %v3268_v51 = vsel %vm2925_vm3, %v3165_v45, 0.0  ;;  %v4324_v24 = vadd.f32 %v2752_v25, %v1652_v15 }
 0x1b2   :  { %v3269_v17 = vadd.f32 %v3268_v51, %v3267_v2  ;;  %2969 = vst.msk [vmem:[#allocation2 + $0x158] sm:$0xff] %vm2925_vm3, %v4323_v41  ;;  %v3072_v49 = vadd.f32 %v3071_v30, %v3070_v14  ;;  %v3168_v5 = vmul.f32 %v4323_v41, %v4323_v41  ;;  %v3075_v28 = vsel %vm2925_vm3, %v4323_v41, 0.0 }
 0x1b3   :  { %2968 = vst.msk [vmem:[#allocation2 + $0x150] sm:$0xff] %vm2925_vm3, %v4324_v24  ;;  %v3073_v11 = vsel %vm2925_vm3, %v4324_v24, 0.0  ;;  %v3167_v46 = vmul.f32 %v4324_v24, %v4324_v24  ;;  %v4057_v6 = vpop.f32.mrb[44].mxu1  ;;  %v4256_v54 = vpop.f32.mrb[46].mxu0 }
 0x1b4   :  { %v3074_v27 = vadd.f32 %v3073_v11, %v3072_v49  ;;  %v3271_v52 = vadd.f32 %v3270_v7, %v3269_v17  ;;  %v4325_v62 = vadd.f32 %v4253_v35, %v4057_v6  ;;  %v1662_v29 = vpop.f32.mrb[45].mxu1  ;;  %v2772_v34 = vpop.f32.mrb[47].mxu0  ;;  %v3274_v59 = vsel %vm2925_vm3, %v3168_v5, 0.0 }
 0x1b5   :  { %v3272_v43 = vsel %vm2925_vm3, %v3167_v46, 0.0  ;;  %v4326_v23 = vadd.f32 %v2762_v36, %v1662_v29 }
 0x1b6   :  { %v3273_v56 = vadd.f32 %v3272_v43, %v3271_v52  ;;  %2971 = vst.msk [vmem:[#allocation2 + $0x168] sm:$0xff] %vm2925_vm3, %v4325_v62  ;;  %v3076_v44 = vadd.f32 %v3075_v28, %v3074_v27  ;;  %v3170_v47 = vmul.f32 %v4325_v62, %v4325_v62  ;;  %v3079_v42 = vsel %vm2925_vm3, %v4325_v62, 0.0 }
 0x1b7   :  { %2970 = vst.msk [vmem:[#allocation2 + $0x160] sm:$0xff] %vm2925_vm3, %v4326_v23  ;;  %v3077_v26 = vsel %vm2925_vm3, %v4326_v23, 0.0  ;;  %v3169_v60 = vmul.f32 %v4326_v23, %v4326_v23  ;;  %v4060_v16 = vpop.f32.mrb[46].mxu1  ;;  %v4259_v12 = vpop.f32.mrb[48].mxu0 }
 0x1b8   :  { %v3078_v13 = vadd.f32 %v3077_v26, %v3076_v44  ;;  %v3275_v19 = vadd.f32 %v3274_v59, %v3273_v56  ;;  %v4327_v40 = vadd.f32 %v4256_v54, %v4060_v16  ;;  %v1672_v57 = vpop.f32.mrb[47].mxu1  ;;  %v2782_v58 = vpop.f32.mrb[49].mxu0  ;;  %v3278_v37 = vsel %vm2925_vm3, %v3170_v47, 0.0 }
 0x1b9   :  { %v3276_v8 = vsel %vm2925_vm3, %v3169_v60, 0.0  ;;  %v4328_v21 = vadd.f32 %v2772_v34, %v1672_v57 }
 0x1ba   :  { %v3277_v39 = vadd.f32 %v3276_v8, %v3275_v19  ;;  %2973 = vst.msk [vmem:[#allocation2 + $0x178] sm:$0xff] %vm2925_vm3, %v4327_v40  ;;  %v3080_v31 = vadd.f32 %v3079_v42, %v3078_v13  ;;  %v3172_v53 = vmul.f32 %v4327_v40, %v4327_v40  ;;  %v3083_v38 = vsel %vm2925_vm3, %v4327_v40, 0.0 }
 0x1bb   :  { %2972 = vst.msk [vmem:[#allocation2 + $0x170] sm:$0xff] %vm2925_vm3, %v4328_v21  ;;  %v3081_v33 = vsel %vm2925_vm3, %v4328_v21, 0.0  ;;  %v3171_v9 = vmul.f32 %v4328_v21, %v4328_v21  ;;  %v4063_v3 = vpop.f32.mrb[48].mxu1  ;;  %v4262_v50 = vpop.f32.mrb[50].mxu0 }
 0x1bc   :  { %v3082_v48 = vadd.f32 %v3081_v33, %v3080_v31  ;;  %v3279_v1 = vadd.f32 %v3278_v37, %v3277_v39  ;;  %v4329_v18 = vadd.f32 %v4259_v12, %v4063_v3  ;;  %v1682_v61 = vpop.f32.mrb[49].mxu1  ;;  %v2792_v25 = vpop.f32.mrb[51].mxu0  ;;  %v3282_v22 = vsel %vm2925_vm3, %v3172_v53, 0.0 }
 0x1bd   :  { %v3280_v20 = vsel %vm2925_vm3, %v3171_v9, 0.0  ;;  %v4330_v63 = vadd.f32 %v2782_v58, %v1682_v61 }
 0x1be   :  { %v3281_v4 = vadd.f32 %v3280_v20, %v3279_v1  ;;  %2975 = vst.msk [vmem:[#allocation2 + $0x188] sm:$0xff] %vm2925_vm3, %v4329_v18  ;;  %v3084_v32 = vadd.f32 %v3083_v38, %v3082_v48  ;;  %v3174_v10 = vmul.f32 %v4329_v18, %v4329_v18  ;;  %v3087_v30 = vsel %vm2925_vm3, %v4329_v18, 0.0 }
 0x1bf   :  { %2974 = vst.msk [vmem:[#allocation2 + $0x180] sm:$0xff] %vm2925_vm3, %v4330_v63  ;;  %v3085_v0 = vsel %vm2925_vm3, %v4330_v63, 0.0  ;;  %v3173_v45 = vmul.f32 %v4330_v63, %v4330_v63  ;;  %v4066_v55 = vpop.f32.mrb[50].mxu1  ;;  %v4265_v35 = vpop.f32.mrb[52].mxu0 }
 0x1c0   :  { %v3086_v14 = vadd.f32 %v3085_v0, %v3084_v32  ;;  %v3283_v2 = vadd.f32 %v3282_v22, %v3281_v4  ;;  %v4331_v41 = vadd.f32 %v4262_v50, %v4066_v55  ;;  %v1692_v15 = vpop.f32.mrb[51].mxu1  ;;  %v2802_v36 = vpop.f32.mrb[53].mxu0  ;;  %v3286_v7 = vsel %vm2925_vm3, %v3174_v10, 0.0 }
 0x1c1   :  { %v3284_v51 = vsel %vm2925_vm3, %v3173_v45, 0.0  ;;  %v4332_v24 = vadd.f32 %v2792_v25, %v1692_v15 }
 0x1c2   :  { %v3285_v17 = vadd.f32 %v3284_v51, %v3283_v2  ;;  %2977 = vst.msk [vmem:[#allocation2 + $0x198] sm:$0xff] %vm2925_vm3, %v4331_v41  ;;  %v3088_v49 = vadd.f32 %v3087_v30, %v3086_v14  ;;  %v3176_v5 = vmul.f32 %v4331_v41, %v4331_v41  ;;  %v3091_v28 = vsel %vm2925_vm3, %v4331_v41, 0.0 }
 0x1c3   :  { %2976 = vst.msk [vmem:[#allocation2 + $0x190] sm:$0xff] %vm2925_vm3, %v4332_v24  ;;  %v3089_v11 = vsel %vm2925_vm3, %v4332_v24, 0.0  ;;  %v3175_v46 = vmul.f32 %v4332_v24, %v4332_v24  ;;  %v4069_v6 = vpop.f32.mrb[52].mxu1  ;;  %v4268_v54 = vpop.f32.mrb[54].mxu0 }
 0x1c4   :  { %v3090_v27 = vadd.f32 %v3089_v11, %v3088_v49  ;;  %v3287_v52 = vadd.f32 %v3286_v7, %v3285_v17  ;;  %v4333_v62 = vadd.f32 %v4265_v35, %v4069_v6  ;;  %v1702_v29 = vpop.f32.mrb[53].mxu1  ;;  %v2812_v34 = vpop.f32.mrb[55].mxu0  ;;  %v3290_v59 = vsel %vm2925_vm3, %v3176_v5, 0.0 }
 0x1c5   :  { %v3288_v43 = vsel %vm2925_vm3, %v3175_v46, 0.0  ;;  %v4334_v23 = vadd.f32 %v2802_v36, %v1702_v29 }
 0x1c6   :  { %v3289_v56 = vadd.f32 %v3288_v43, %v3287_v52  ;;  %2979 = vst.msk [vmem:[#allocation2 + $0x1a8] sm:$0xff] %vm2925_vm3, %v4333_v62  ;;  %v3092_v44 = vadd.f32 %v3091_v28, %v3090_v27  ;;  %v3178_v47 = vmul.f32 %v4333_v62, %v4333_v62  ;;  %v3095_v42 = vsel %vm2925_vm3, %v4333_v62, 0.0 }
 0x1c7   :  { %2978 = vst.msk [vmem:[#allocation2 + $0x1a0] sm:$0xff] %vm2925_vm3, %v4334_v23  ;;  %v3093_v26 = vsel %vm2925_vm3, %v4334_v23, 0.0  ;;  %v3177_v60 = vmul.f32 %v4334_v23, %v4334_v23  ;;  %v4072_v16 = vpop.f32.mrb[54].mxu1  ;;  %v4271_v12 = vpop.f32.mrb[56].mxu0 }
 0x1c8   :  { %v3094_v13 = vadd.f32 %v3093_v26, %v3092_v44  ;;  %v3291_v19 = vadd.f32 %v3290_v59, %v3289_v56  ;;  %v4335_v40 = vadd.f32 %v4268_v54, %v4072_v16  ;;  %v1712_v57 = vpop.f32.mrb[55].mxu1  ;;  %v2822_v58 = vpop.f32.mrb[57].mxu0  ;;  %v3294_v37 = vsel %vm2925_vm3, %v3178_v47, 0.0 }
 0x1c9   :  { %v3292_v8 = vsel %vm2925_vm3, %v3177_v60, 0.0  ;;  %v4336_v21 = vadd.f32 %v2812_v34, %v1712_v57 }
 0x1ca   :  { %v3293_v39 = vadd.f32 %v3292_v8, %v3291_v19  ;;  %2981 = vst.msk [vmem:[#allocation2 + $0x1b8] sm:$0xff] %vm2925_vm3, %v4335_v40  ;;  %v3096_v31 = vadd.f32 %v3095_v42, %v3094_v13  ;;  %v3180_v53 = vmul.f32 %v4335_v40, %v4335_v40  ;;  %v3099_v38 = vsel %vm2925_vm3, %v4335_v40, 0.0 }
 0x1cb   :  { %2980 = vst.msk [vmem:[#allocation2 + $0x1b0] sm:$0xff] %vm2925_vm3, %v4336_v21  ;;  %v3097_v33 = vsel %vm2925_vm3, %v4336_v21, 0.0  ;;  %v3179_v9 = vmul.f32 %v4336_v21, %v4336_v21  ;;  %v4075_v3 = vpop.f32.mrb[56].mxu1  ;;  %v4274_v50 = vpop.f32.mrb[58].mxu0 }
 0x1cc   :  { %v3098_v48 = vadd.f32 %v3097_v33, %v3096_v31  ;;  %v3295_v1 = vadd.f32 %v3294_v37, %v3293_v39  ;;  %v4337_v18 = vadd.f32 %v4271_v12, %v4075_v3  ;;  %v1722_v61 = vpop.f32.mrb[57].mxu1  ;;  %v2832_v25 = vpop.f32.mrb[59].mxu0  ;;  %v3298_v22 = vsel %vm2925_vm3, %v3180_v53, 0.0 }
 0x1cd   :  { %v3296_v20 = vsel %vm2925_vm3, %v3179_v9, 0.0  ;;  %v4338_v63 = vadd.f32 %v2822_v58, %v1722_v61 }
 0x1ce   :  { %v3297_v4 = vadd.f32 %v3296_v20, %v3295_v1  ;;  %2983 = vst.msk [vmem:[#allocation2 + $0x1c8] sm:$0xff] %vm2925_vm3, %v4337_v18  ;;  %v3100_v32 = vadd.f32 %v3099_v38, %v3098_v48  ;;  %v3182_v10 = vmul.f32 %v4337_v18, %v4337_v18  ;;  %v3103_v30 = vsel %vm2925_vm3, %v4337_v18, 0.0 }
 0x1cf   :  { %2982 = vst.msk [vmem:[#allocation2 + $0x1c0] sm:$0xff] %vm2925_vm3, %v4338_v63  ;;  %v3101_v0 = vsel %vm2925_vm3, %v4338_v63, 0.0  ;;  %v3181_v45 = vmul.f32 %v4338_v63, %v4338_v63  ;;  %v4078_v55 = vpop.f32.mrb[58].mxu1  ;;  %v4277_v35 = vpop.f32.mrb[60].mxu0 }
 0x1d0   :  { %v3102_v14 = vadd.f32 %v3101_v0, %v3100_v32  ;;  %v3299_v2 = vadd.f32 %v3298_v22, %v3297_v4  ;;  %v4339_v41 = vadd.f32 %v4274_v50, %v4078_v55  ;;  %v1732_v15 = vpop.f32.mrb[59].mxu1  ;;  %v2842_v36 = vpop.f32.mrb[61].mxu0  ;;  %v3302_v7 = vsel %vm2925_vm3, %v3182_v10, 0.0 }
 0x1d1   :  { %v3300_v51 = vsel %vm2925_vm3, %v3181_v45, 0.0  ;;  %v4340_v24 = vadd.f32 %v2832_v25, %v1732_v15 }
 0x1d2   :  { %v3301_v17 = vadd.f32 %v3300_v51, %v3299_v2  ;;  %2985 = vst.msk [vmem:[#allocation2 + $0x1d8] sm:$0xff] %vm2925_vm3, %v4339_v41  ;;  %v3104_v49 = vadd.f32 %v3103_v30, %v3102_v14  ;;  %v3184_v5 = vmul.f32 %v4339_v41, %v4339_v41  ;;  %v3107_v28 = vsel %vm2925_vm3, %v4339_v41, 0.0 }
 0x1d3   :  { %2984 = vst.msk [vmem:[#allocation2 + $0x1d0] sm:$0xff] %vm2925_vm3, %v4340_v24  ;;  %v3105_v11 = vsel %vm2925_vm3, %v4340_v24, 0.0  ;;  %v3183_v46 = vmul.f32 %v4340_v24, %v4340_v24  ;;  %v4081_v6 = vpop.f32.mrb[60].mxu1  ;;  %v4280_v54 = vpop.f32.mrb[62].mxu0 }
 0x1d4   :  { %v3106_v27 = vadd.f32 %v3105_v11, %v3104_v49  ;;  %v3303_v52 = vadd.f32 %v3302_v7, %v3301_v17  ;;  %v4341_v62 = vadd.f32 %v4277_v35, %v4081_v6  ;;  %v1742_v29 = vpop.f32.mrb[61].mxu1  ;;  %v2852_v34 = vpop.f32.mrb[63].mxu0  ;;  %v3306_v59 = vsel %vm2925_vm3, %v3184_v5, 0.0 }
 0x1d5   :  { %v3304_v43 = vsel %vm2925_vm3, %v3183_v46, 0.0  ;;  %v4342_v23 = vadd.f32 %v2842_v36, %v1742_v29 }
 0x1d6   :  { %v3305_v56 = vadd.f32 %v3304_v43, %v3303_v52  ;;  %2987 = vst.msk [vmem:[#allocation2 + $0x1e8] sm:$0xff] %vm2925_vm3, %v4341_v62  ;;  %v3108_v44 = vadd.f32 %v3107_v28, %v3106_v27  ;;  %v3186_v47 = vmul.f32 %v4341_v62, %v4341_v62  ;;  %v3111_v57 = vsel %vm2925_vm3, %v4341_v62, 0.0 }
 0x1d7   :  { %2986 = vst.msk [vmem:[#allocation2 + $0x1e0] sm:$0xff] %vm2925_vm3, %v4342_v23  ;;  %v3109_v26 = vsel %vm2925_vm3, %v4342_v23, 0.0  ;;  %v3185_v60 = vmul.f32 %v4342_v23, %v4342_v23  ;;  %v4084_v16 = vpop.f32.mrb[62].mxu1 }
 0x1d8   :  { %v3110_v12 = vadd.f32 %v3109_v26, %v3108_v44  ;;  %v3307_v13 = vadd.f32 %v3306_v59, %v3305_v56  ;;  %v4343_v19 = vadd.f32 %v4280_v54, %v4084_v16  ;;  %v1752_v40 = vpop.f32.mrb[63].mxu1  ;;  %v3310_v39 = vsel %vm2925_vm3, %v3186_v47, 0.0 }
 0x1d9   :  { %v3308_v58 = vsel %vm2925_vm3, %v3185_v60, 0.0  ;;  %v4344_v42 = vadd.f32 %v2852_v34, %v1752_v40 }
 0x1da   :  { %v3309_v8 = vadd.f32 %v3308_v58, %v3307_v13  ;;  %2989 = vst.msk [vmem:[#allocation2 + $0x1f8] sm:$0xff] %vm2925_vm3, %v4343_v19  ;;  %v3112_v21 = vadd.f32 %v3111_v57, %v3110_v12  ;;  %v3188_v31 = vmul.f32 %v4343_v19, %v4343_v19 }
 0x1db   :  { %2988 = vst.msk [vmem:[#allocation2 + $0x1f0] sm:$0xff] %vm2925_vm3, %v4344_v42  ;;  %v3113_v37 = vsel %vm2925_vm3, %v4344_v42, 0.0  ;;  %v3187_v53 = vmul.f32 %v4344_v42, %v4344_v42 }
 0x1dc   :  { %v3114_v33 = vadd.f32 %v3113_v37, %v3112_v21  ;;  %v3311_v9 = vadd.f32 %v3310_v39, %v3309_v8 }
 0x1dd   :  { %4502 = shalt.err (!%p4499_p4)
}
 0x1de   :  { %s4503_s22 = scalar_lea.hbm %s6419_s3, 8192 }
 0x1df   :  { %p4504_p5 = scmp.ne.s32.totalorder %s6419_s3, %s4503_s22  ;;  %p4507_p6 = scmp.lt.u32.totalorder %s4503_s22, %s6419_s3 }
 0x1e1   :  { %p4509_p7 = pnand %p4507_p6, %p4504_p5 }
 0x1e3   :  { %4512 = shalt.err (!%p4509_p7)
}
 0x1e4   :  { %s4562_s27 = smov 128   ;;  %s4563_s28 = smov 8   ;;  %v3115_v3 = vsel %vm2925_vm3, %v4343_v19, 0.0  ;;  %v3312_v50 = vsel %vm2925_vm3, %v3187_v53, 0.0  ;;  %v3314_v18 = vsel %vm2925_vm3, %v3188_v31, 0.0  ;;  %vm3123_vm4 = vcmask 253952  }
 0x1e5   :  { %3334 = dma.vmem_to_hbm [thread:$0]  %s6354_s18, 8192, %s6419_s3, [#allocation3], %s4562_s27, %s4562_s27, %s4563_s28   ;;  %v3116_v48 = vadd.f32 %v3115_v3, %v3114_v33  ;;  %v3313_v1 = vadd.f32 %v3312_v50, %v3311_v9 }
 0x1e6   :  { %s4564_s30 = smov [#allocation4]   ;;  %s4565_s3 = smov [#allocation6]  }
 0x1e7   :  { %v3117_v61 = vrot.slane %v3116_v48, 4  ;;  %v3315_v25 = vadd.f32 %v3314_v18, %v3313_v1  ;;  %s3341_s6 = sshll.u32 %s4564_s30, 4  ;;  %s3351_s7 = sshll.u32 %s4565_s3, 4  ;;  %s3342_s6 = int_to_ptr.vmem [resolvable:$true] %s3341_s6  ;;  %s6383_s7 = int_to_ptr.vmem [resolvable:$true] %s3351_s7 }
 0x1e8   :  { %s4513_s8 = scalar_lea.vmem %s3342_s6, 16  ;;  %s4517_s9 = scalar_lea.vmem %s3342_s6, 32 }
 0x1e9   :  { %v3118_v38 = vadd.f32 %v3117_v61, %v3116_v48  ;;  %v3316_v20 = vrot.slane %v3315_v25, 4  ;;  %p4514_p8 = scmp.ne.s32.totalorder %s3342_s6, %s4513_s8  ;;  %p4518_p9 = scmp.lt.s32.totalorder %s3342_s6, %s3342_s6 }
 0x1ea   :  { %p4519_p10 = scmp.lt.s32.totalorder %s4517_s9, %s4513_s8 }
 0x1eb   :  { %v3119_v63 = vrot.slane %v3118_v38, 2  ;;  %v3317_v4 = vadd.f32 %v3316_v20, %v3315_v25 }
 0x1ec   :  { %p4520_p11 = por %p4519_p10, %p4518_p9 }
 0x1ed   :  { %v3120_v32 = vadd.f32 %v3119_v63, %v3118_v38  ;;  %v3318_v22 = vrot.slane %v3317_v4, 2 }
 0x1ee   :  { %p4521_p12 = pnand %p4520_p11, %p4514_p8 }
 0x1ef   :  { %v3121_v10 = vrot.slane %v3120_v32, 1  ;;  %v3319_v0 = vadd.f32 %v3318_v22, %v3317_v4 }
 0x1f1   :  { %v3122_v45 = vadd.f32 %v3121_v10, %v3120_v32  ;;  %v3320_v55 = vrot.slane %v3319_v0, 1 }
 0x1f3   :  { %3124 = vst.msk [vmem:[#allocation4] sm:$0x1] %vm3123_vm4, %v3122_v45  ;;  %v3321_v35 = vadd.f32 %v3320_v55, %v3319_v0 }
 0x1f4   :  { %4524 = shalt.err (!%p4521_p12)
}
 0x1f5   :  { %s4525_s12 = scalar_lea.hbm %s6420_s4, 16 }
 0x1f6   :  { %p4526_p13 = scmp.ne.s32.totalorder %s6420_s4, %s4525_s12  ;;  %p4529_p0 = scmp.lt.u32.totalorder %s4525_s12, %s6420_s4 }
 0x1f8   :  { %p4531_p1 = pnand %p4529_p0, %p4526_p13 }
 0x1fa   :  { %4534 = shalt.err (!%p4531_p1)
}
 0x1fb   :  { %3344 = dma.vmem_to_hbm [thread:$0]  %s3342_s6, 16, %s6420_s4, [#allocation5]   ;;  %3322 = vst.msk [vmem:[#allocation6] sm:$0x1] %vm3123_vm4, %v3321_v35 }
 0x1fc   :  { %s4535_s1 = scalar_lea.vmem %s6383_s7, 16  ;;  %s4539_s18 = scalar_lea.vmem %s6383_s7, 32 }
 0x1fd   :  { %p4536_p2 = scmp.ne.s32.totalorder %s6383_s7, %s4535_s1  ;;  %p4540_p3 = scmp.lt.s32.totalorder %s6383_s7, %s6383_s7 }
 0x1fe   :  { %p4541_p4 = scmp.lt.s32.totalorder %s4539_s18, %s4535_s1 }
 0x200   :  { %p4542_p5 = por %p4541_p4, %p4540_p3 }
 0x202   :  { %p4543_p6 = pnand %p4542_p5, %p4536_p2 }
 0x204   :  { %4546 = shalt.err (!%p4543_p6)
}
 0x205   :  { %s4547_s21 = scalar_lea.hbm %s6421_s5, 16 }
 0x206   :  { %p4548_p7 = scmp.ne.s32.totalorder %s6421_s5, %s4547_s21  ;;  %p4551_p8 = scmp.lt.u32.totalorder %s4547_s21, %s6421_s5 }
 0x208   :  { %p4553_p9 = pnand %p4551_p8, %p4548_p7 }
 0x20a   :  { %4556 = shalt.err (!%p4553_p9)
}
 0x20b   :  { %3354 = dma.vmem_to_hbm [thread:$0]  %s6383_s7, 16, %s6421_s5, [#allocation5]  }
 0x20c   :  { %4557 = dma.done.wait [#allocation3], 8192  }
 0x20d   :  { %4558 = vsyncadd [#allocation3], 4294959104 }
 0x20e   :  { %4559 = dma.done.wait [#allocation5], 32  }
 0x20f   :  { %4560 = vsyncadd [#allocation5], 4294967264 }
 0x210   :  { %3364 = vsyncpa [#allocation3], 1 }
 0x211   :  { %3365 = vsyncpa [#allocation5], 1 }

</bundles_post_ra>
